<compile_context>
chip_gen: v7x
topology: tpu7x:2x2x1
jax: 0.10.0
libtpu: 0.0.40
codegen_flags: <defaults>
</compile_context>

<pallas_src>
import numpy as np

import jax
import jax.numpy as jnp
from jax.experimental import pallas as pl
from jax.experimental.pallas import tpu as pltpu


# ----------------------------- model constants ------------------------------
IN_CH, IMG_H, IMG_W = 4, 16, 16
CONV_CH = 8
KH = KW = 3
STRIDE = 2
OH = (IMG_H - KH) // STRIDE + 1            # 7
OW = (IMG_W - KW) // STRIDE + 1            # 7
OBS_FLAT = IN_CH * IMG_H * IMG_W           # 1024 (already a lane multiple)
CONV_FLAT = CONV_CH * OH * OW              # 392
LATENT = 32
HIDDEN = 32
ACTION_DIM = 4
AUX = ACTION_DIM + 1                       # prev_action + prev_reward = 5

LANE = 128
SUB = 8


def _ru(x, m):
    return (x + m - 1) // m * m


CONV_NP = _ru(CONV_FLAT, LANE)             # 512
LAT_NP = _ru(LATENT, LANE)                 # 128
HID_NP = _ru(HIDDEN, LANE)                 # 128
OUT_NP = _ru(2 * ACTION_DIM, LANE)         # 128


# ------------------------------ parameters ----------------------------------
def init_params(key):
    """Raw (unpadded) parameters; linear weights stored as [in, out]."""
    ks = jax.random.split(key, 8)
    s = 0.1
    return {
        "conv_w": jax.random.normal(ks[0], (CONV_CH, IN_CH, KH, KW), jnp.float32) * s,
        "conv_b": jax.random.normal(ks[1], (CONV_CH,), jnp.float32) * s,
        "fc1_w": jax.random.normal(ks[2], (CONV_FLAT, LATENT), jnp.float32) * s,
        "fc1_b": jax.random.normal(ks[3], (LATENT,), jnp.float32) * s,
        "mlp_w1": jax.random.normal(ks[4], (LATENT + AUX, HIDDEN), jnp.float32) * s,
        "mlp_b1": jax.random.normal(ks[5], (HIDDEN,), jnp.float32) * s,
        "mlp_w2": jax.random.normal(ks[6], (HIDDEN, 2 * ACTION_DIM), jnp.float32) * s,
        "mlp_b2": jax.random.normal(ks[7], (2 * ACTION_DIM,), jnp.float32) * s,
    }


def _conv_to_toeplitz(conv_w):
    """conv_w [OC, IC, KH, KW] -> T [IC*H*W, OC*OH*OW] such that
    obs.reshape(B, IC*H*W) @ T == Conv2d(stride=2, VALID)(obs) flattened NCHW."""
    w = np.asarray(conv_w, dtype=np.float32)
    w_t = np.transpose(w, (1, 2, 3, 0))                      # [IC, KH, KW, OC]
    t = np.zeros((IN_CH, IMG_H, IMG_W, CONV_CH, OH, OW), dtype=np.float32)
    for oh in range(OH):
        for ow in range(OW):
            t[:, STRIDE * oh:STRIDE * oh + KH,
              STRIDE * ow:STRIDE * ow + KW, :, oh, ow] = w_t
    return t.reshape(IN_CH * IMG_H * IMG_W, CONV_CH * OH * OW)


def pack_params(raw):
    """One-time packing: fold conv into a Toeplitz matrix, split mlp_w1 into a
    latent part and an aux (prev_action / prev_reward) part, zero-pad to
    lane-aligned tiles.  Matmul weights are stored in bfloat16 (halves HBM
    DMA + VMEM); biases and the tiny aux rows stay float32."""
    def pad2(a, rows, cols, dtype=jnp.bfloat16):
        a = np.asarray(a, np.float32)
        out = np.zeros((rows, cols), np.float32)
        out[: a.shape[0], : a.shape[1]] = a
        return jnp.asarray(out, dtype)

    def pad_row(a, cols):
        a = np.asarray(a, np.float32).reshape(1, -1)
        out = np.zeros((1, cols), np.float32)
        out[0, : a.shape[1]] = a
        return jnp.asarray(out)

    cw = _conv_to_toeplitz(raw["conv_w"])                            # [1024, 392]
    cb = np.repeat(np.asarray(raw["conv_b"], np.float32), OH * OW)   # [392]
    w1 = np.asarray(raw["mlp_w1"], np.float32)

    return {
        "cw": pad2(cw, OBS_FLAT, CONV_NP),                        # bf16 [1024, 512]
        "cb": pad_row(cb, CONV_NP),                               # f32  [1, 512]
        "f1w": pad2(raw["fc1_w"], CONV_NP, LAT_NP),               # bf16 [512, 128]
        "f1b": pad_row(raw["fc1_b"], LAT_NP),                     # f32  [1, 128]
        "wl": pad2(w1[:LATENT], LAT_NP, HID_NP),                  # bf16 [128, 128]
        "wa": pad2(w1[LATENT:LATENT + AUX], SUB, HID_NP,
                   dtype=jnp.float32),                            # f32  [8, 128]
        "b1": pad_row(raw["mlp_b1"], HID_NP),                     # f32  [1, 128]
        "w2": pad2(raw["mlp_w2"], HID_NP, OUT_NP),                # bf16 [128, 128]
        "b2": pad_row(raw["mlp_b2"], OUT_NP),                     # f32  [1, 128]
    }


# ------------------------------ fused kernel --------------------------------
def _sac_fused_kernel(x_ref, pa_ref, pr_ref,
                      cw_ref, cb_ref, f1w_ref, f1b_ref,
                      wl_ref, wa_ref, b1_ref, w2_ref, b2_ref,
                      conv_ref, lat_ref, pi_ref):
    f32 = jnp.float32

    # conv (Toeplitz matmul) + bias + ReLU -> already NCHW-flattened order.
    # bf16 weights are up-cast so the accumulation stays f32-accurate.
    conv = jnp.dot(x_ref[...], cw_ref[...].astype(f32), preferred_element_type=f32)
    conv = jnp.maximum(conv + cb_ref[...], 0.0)
    conv_ref[...] = conv

    # pi_fc1: Linear + ReLU
    lat = jnp.dot(conv, f1w_ref[...].astype(f32), preferred_element_type=f32)
    lat = jnp.maximum(lat + f1b_ref[...], 0.0)
    lat_ref[...] = lat

    # pi_mlp hidden: latent @ W_lat + b1, then the 5 aux columns
    # ([prev_action | prev_reward]) applied as broadcast VPU FMAs against the
    # corresponding rows of mlp_w1 (no 128x128 MXU matmul for 5 rows of work).
    h = jnp.dot(lat, wl_ref[...].astype(f32), preferred_element_type=f32) + b1_ref[...]
    pa = pa_ref[...]                         # (B, ACTION_DIM)
    wa = wa_ref[...]                         # (8, HID_NP), rows 0..3 action, 4 reward
    for j in range(ACTION_DIM):
        h = h + pa[:, j:j + 1] * wa[j:j + 1, :]
    h = h + pr_ref[...] * wa[ACTION_DIM:ACTION_DIM + 1, :]
    h = jnp.maximum(h, 0.0)

    # pi_mlp output slab (mu | log_std), lane-dense padded store
    pi_ref[...] = (jnp.dot(h, w2_ref[...].astype(f32), preferred_element_type=f32)
                   + b2_ref[...])


@jax.jit
def sac_model_forward(kparams, observation, prev_action, prev_reward):
    """Returns (mu, log_std, latent, conv) matching SacModel.forward."""
    B = observation.shape[0]

    # Only runtime prep: flatten obs (free, NCHW contiguous) and reshape the
    # tiny aux vectors.  No padding / concat glue ops.
    x = observation.astype(jnp.float32).reshape(B, OBS_FLAT)
    pa = prev_action.astype(jnp.float32).reshape(B, ACTION_DIM)
    pr = prev_reward.astype(jnp.float32).reshape(B, 1)

    ins = (x, pa, pr,
           kparams["cw"], kparams["cb"], kparams["f1w"], kparams["f1b"],
           kparams["wl"], kparams["wa"], kparams["b1"],
           kparams["w2"], kparams["b2"])

    vmem = pl.BlockSpec(memory_space=pltpu.MemorySpace.VMEM)

    conv_p, lat_p, pi_p = pl.pallas_call(
        _sac_fused_kernel,
        out_shape=(jax.ShapeDtypeStruct((B, CONV_NP), jnp.float32),
                   jax.ShapeDtypeStruct((B, LAT_NP), jnp.float32),
                   jax.ShapeDtypeStruct((B, OUT_NP), jnp.float32)),
        in_specs=[vmem] * len(ins),
        out_specs=(vmem, vmem, vmem),
    )(*ins)

    conv = conv_p[:, :CONV_FLAT]
    latent = lat_p[:, :LATENT]
    mu = pi_p[:, :ACTION_DIM]
    log_std = pi_p[:, ACTION_DIM:2 * ACTION_DIM]
    return mu, log_std, latent, conv


# --------------------------- pure-JAX reference -----------------------------
def reference_forward(raw, observation, prev_action, prev_reward,
                      bf16_weights=False):
    """Plain-JAX reference.  With bf16_weights=True the weights are rounded
    through bfloat16 exactly like pack_params does, so the comparison against
    the kernel isolates structural bugs from expected bf16 rounding."""
    def w(a):
        a = jnp.asarray(a, jnp.float32)
        if bf16_weights:
            a = a.astype(jnp.bfloat16).astype(jnp.float32)
        return a

    B = observation.shape[0]
    conv = jax.lax.conv_general_dilated(
        observation.astype(jnp.float32), w(raw["conv_w"]), (STRIDE, STRIDE),
        "VALID", dimension_numbers=("NCHW", "OIHW", "NCHW"))
    conv = jnp.maximum(conv + raw["conv_b"][None, :, None, None], 0.0)
    conv_flat = conv.reshape(B, -1)
    latent = jnp.maximum(conv_flat @ w(raw["fc1_w"]) + raw["fc1_b"], 0.0)
    mlp_in = jnp.concatenate(
        [latent, prev_action.astype(jnp.float32),
         prev_reward.astype(jnp.float32).reshape(B, 1)], axis=1)
    h = jnp.maximum(mlp_in @ w(raw["mlp_w1"]) + raw["mlp_b1"], 0.0)
    out = h @ w(raw["mlp_w2"]) + raw["mlp_b2"]
    mu, log_std = jnp.split(out, 2, axis=-1)
    return mu, log_std, latent, conv_flat


# --------------------------------- main --------------------------------------
if __name__ == "__main__":
    key = jax.random.PRNGKey(0)
    kp, ko, ka, kr = jax.random.split(key, 4)
    B = 2

    raw_params = init_params(kp)
    kparams = pack_params(raw_params)

    observation = jax.random.normal(ko, (B, IN_CH, IMG_H, IMG_W), jnp.float32)
    prev_action = jax.random.normal(ka, (B, ACTION_DIM), jnp.float32)
    prev_reward = jax.random.normal(kr, (B,), jnp.float32)

    mu, log_std, latent, conv = sac_model_forward(
        kparams, observation, prev_action, prev_reward)
    jax.block_until_ready((mu, log_std, latent, conv))

    assert mu.shape == (B, ACTION_DIM)
    assert log_std.shape == (B, ACTION_DIM)
    assert latent.shape == (B, LATENT)
    assert conv.shape == (B, CONV_FLAT)

    # Check 1: against a reference using the same bf16-rounded weights — this
    # catches structural bugs (bad Toeplitz fold, wrong aux rows, bad slices)
    # with a tolerance that only has to absorb matmul accumulation-order /
    # MXU-pass differences.
    r = reference_forward(raw_params, observation, prev_action, prev_reward,
                          bf16_weights=True)
    # Check 2: against the exact-f32 reference — tolerance covers the expected
    # bf16 weight-representation error (weights are intentionally bf16 now).
    r32 = reference_forward(raw_params, observation, prev_action, prev_reward,
                            bf16_weights=False)

    got = (conv, latent, mu, log_std)
    names = ("conv", "latent", "mu", "log_std")
    ref_bf16 = (r[3], r[2], r[0], r[1])
    ref_f32 = (r32[3], r32[2], r32[0], r32[1])
    for name, a, b, c in zip(names, got, ref_bf16, ref_f32):
        err_b = float(jnp.max(jnp.abs(a - b)))
        err_f = float(jnp.max(jnp.abs(a - c)))
        assert err_b < 2e-2, f"{name} mismatch vs bf16-weight reference: {err_b}"
        assert err_f < 5e-2, f"{name} mismatch vs f32 reference: {err_f}"

    print("KERNEL_OK")
</pallas_src>

<mosaic_0001>
module attributes {stable_mosaic.version = 11 : i64} {
  func.func @_sac_fused_kernel(%arg0: memref<2x1024xf32, #tpu.memory_space<vmem>>, %arg1: memref<2x4xf32, #tpu.memory_space<vmem>>, %arg2: memref<2x1xf32, #tpu.memory_space<vmem>>, %arg3: memref<1024x512xbf16, #tpu.memory_space<vmem>>, %arg4: memref<1x512xf32, #tpu.memory_space<vmem>>, %arg5: memref<512x128xbf16, #tpu.memory_space<vmem>>, %arg6: memref<1x128xf32, #tpu.memory_space<vmem>>, %arg7: memref<128x128xbf16, #tpu.memory_space<vmem>>, %arg8: memref<8x128xf32, #tpu.memory_space<vmem>>, %arg9: memref<1x128xf32, #tpu.memory_space<vmem>>, %arg10: memref<128x128xbf16, #tpu.memory_space<vmem>>, %arg11: memref<1x128xf32, #tpu.memory_space<vmem>>, %arg12: memref<2x512xf32, #tpu.memory_space<vmem>>, %arg13: memref<2x128xf32, #tpu.memory_space<vmem>>, %arg14: memref<2x128xf32, #tpu.memory_space<vmem>>) attributes {dimension_semantics = [], scalar_prefetch = 0 : i64, scratch_operands = 0 : i64, tpu.core_type = #tpu.core_type<tc>} {
    %c0 = arith.constant 0 : index
    %c0_0 = arith.constant 0 : index
    %0 = vector.load %arg0[%c0, %c0_0] : memref<2x1024xf32, #tpu.memory_space<vmem>>, vector<2x1024xf32>
    %c0_1 = arith.constant 0 : index
    %c0_2 = arith.constant 0 : index
    %1 = vector.load %arg3[%c0_1, %c0_2] : memref<1024x512xbf16, #tpu.memory_space<vmem>>, vector<1024x512xbf16>
    %2 = arith.extf %1 : vector<1024x512xbf16> to vector<1024x512xf32>
    %cst = arith.constant dense<0.000000e+00> : vector<2x512xf32>
    %3 = tpu.matmul %0, %2, %cst {dimension_numbers = #tpu.dot_dimension_numbers<[1], [0], [0], [1], [0, 0, 1, 1], [], []>} : vector<2x1024xf32>, vector<1024x512xf32>, vector<2x512xf32> -> vector<2x512xf32>
    %c0_3 = arith.constant 0 : index
    %c0_4 = arith.constant 0 : index
    %4 = vector.load %arg4[%c0_3, %c0_4] : memref<1x512xf32, #tpu.memory_space<vmem>>, vector<1x512xf32>
    %5 = vector.broadcast %4 : vector<1x512xf32> to vector<2x512xf32>
    %6 = arith.addf %3, %5 : vector<2x512xf32>
    %cst_5 = arith.constant 0.000000e+00 : f32
    %7 = vector.broadcast %cst_5 : f32 to vector<2x512xf32>
    %8 = arith.maximumf %6, %7 : vector<2x512xf32>
    %c0_6 = arith.constant 0 : index
    %c0_7 = arith.constant 0 : index
    %9 = vector.load %arg12[%c0_6, %c0_7] : memref<2x512xf32, #tpu.memory_space<vmem>>, vector<2x512xf32>
    tpu.vector_store %arg12[%c0_6, %c0_7], %8 {strides = array<i32>} : memref<2x512xf32, #tpu.memory_space<vmem>>, vector<2x512xf32>,
    %c0_8 = arith.constant 0 : index
    %c0_9 = arith.constant 0 : index
    %10 = vector.load %arg5[%c0_8, %c0_9] : memref<512x128xbf16, #tpu.memory_space<vmem>>, vector<512x128xbf16>
    %11 = arith.extf %10 : vector<512x128xbf16> to vector<512x128xf32>
    %cst_10 = arith.constant dense<0.000000e+00> : vector<2x128xf32>
    %12 = tpu.matmul %8, %11, %cst_10 {dimension_numbers = #tpu.dot_dimension_numbers<[1], [0], [0], [1], [0, 0, 1, 1], [], []>} : vector<2x512xf32>, vector<512x128xf32>, vector<2x128xf32> -> vector<2x128xf32>
    %c0_11 = arith.constant 0 : index
    %c0_12 = arith.constant 0 : index
    %13 = vector.load %arg6[%c0_11, %c0_12] : memref<1x128xf32, #tpu.memory_space<vmem>>, vector<1x128xf32>
    %14 = vector.broadcast %13 : vector<1x128xf32> to vector<2x128xf32>
    %15 = arith.addf %12, %14 : vector<2x128xf32>
    %cst_13 = arith.constant 0.000000e+00 : f32
    %16 = vector.broadcast %cst_13 : f32 to vector<2x128xf32>
    %17 = arith.maximumf %15, %16 : vector<2x128xf32>
    %c0_14 = arith.constant 0 : index
    %c0_15 = arith.constant 0 : index
    %18 = vector.load %arg13[%c0_14, %c0_15] : memref<2x128xf32, #tpu.memory_space<vmem>>, vector<2x128xf32>
    tpu.vector_store %arg13[%c0_14, %c0_15], %17 {strides = array<i32>} : memref<2x128xf32, #tpu.memory_space<vmem>>, vector<2x128xf32>,
    %c0_16 = arith.constant 0 : index
    %c0_17 = arith.constant 0 : index
    %19 = vector.load %arg7[%c0_16, %c0_17] : memref<128x128xbf16, #tpu.memory_space<vmem>>, vector<128x128xbf16>
    %20 = arith.extf %19 : vector<128x128xbf16> to vector<128x128xf32>
    %cst_18 = arith.constant dense<0.000000e+00> : vector<2x128xf32>
    %21 = tpu.matmul %17, %20, %cst_18 {dimension_numbers = #tpu.dot_dimension_numbers<[1], [0], [0], [1], [0, 0, 1, 1], [], []>} : vector<2x128xf32>, vector<128x128xf32>, vector<2x128xf32> -> vector<2x128xf32>
    %c0_19 = arith.constant 0 : index
    %c0_20 = arith.constant 0 : index
    %22 = vector.load %arg9[%c0_19, %c0_20] : memref<1x128xf32, #tpu.memory_space<vmem>>, vector<1x128xf32>
    %23 = vector.broadcast %22 : vector<1x128xf32> to vector<2x128xf32>
    %24 = arith.addf %21, %23 : vector<2x128xf32>
    %c0_21 = arith.constant 0 : index
    %c0_22 = arith.constant 0 : index
    %25 = vector.load %arg1[%c0_21, %c0_22] : memref<2x4xf32, #tpu.memory_space<vmem>>, vector<2x4xf32>
    %c0_23 = arith.constant 0 : index
    %c0_24 = arith.constant 0 : index
    %26 = vector.load %arg8[%c0_23, %c0_24] : memref<8x128xf32, #tpu.memory_space<vmem>>, vector<8x128xf32>
    %27 = vector.extract_strided_slice %25 {offsets = [0, 0], sizes = [2, 1], strides = [1, 1]} : vector<2x4xf32> to vector<2x1xf32>
    %28 = vector.extract_strided_slice %26 {offsets = [0, 0], sizes = [1, 128], strides = [1, 1]} : vector<8x128xf32> to vector<1x128xf32>
    %29 = vector.broadcast %27 : vector<2x1xf32> to vector<2x128xf32>
    %30 = vector.broadcast %28 : vector<1x128xf32> to vector<2x128xf32>
    %31 = arith.mulf %29, %30 : vector<2x128xf32>
    %32 = arith.addf %24, %31 : vector<2x128xf32>
    %33 = vector.extract_strided_slice %25 {offsets = [0, 1], sizes = [2, 1], strides = [1, 1]} : vector<2x4xf32> to vector<2x1xf32>
    %34 = vector.extract_strided_slice %26 {offsets = [1, 0], sizes = [1, 128], strides = [1, 1]} : vector<8x128xf32> to vector<1x128xf32>
    %35 = vector.broadcast %33 : vector<2x1xf32> to vector<2x128xf32>
    %36 = vector.broadcast %34 : vector<1x128xf32> to vector<2x128xf32>
    %37 = arith.mulf %35, %36 : vector<2x128xf32>
    %38 = arith.addf %32, %37 : vector<2x128xf32>
    %39 = vector.extract_strided_slice %25 {offsets = [0, 2], sizes = [2, 1], strides = [1, 1]} : vector<2x4xf32> to vector<2x1xf32>
    %40 = vector.extract_strided_slice %26 {offsets = [2, 0], sizes = [1, 128], strides = [1, 1]} : vector<8x128xf32> to vector<1x128xf32>
    %41 = vector.broadcast %39 : vector<2x1xf32> to vector<2x128xf32>
    %42 = vector.broadcast %40 : vector<1x128xf32> to vector<2x128xf32>
    %43 = arith.mulf %41, %42 : vector<2x128xf32>
    %44 = arith.addf %38, %43 : vector<2x128xf32>
    %45 = vector.extract_strided_slice %25 {offsets = [0, 3], sizes = [2, 1], strides = [1, 1]} : vector<2x4xf32> to vector<2x1xf32>
    %46 = vector.extract_strided_slice %26 {offsets = [3, 0], sizes = [1, 128], strides = [1, 1]} : vector<8x128xf32> to vector<1x128xf32>
    %47 = vector.broadcast %45 : vector<2x1xf32> to vector<2x128xf32>
    %48 = vector.broadcast %46 : vector<1x128xf32> to vector<2x128xf32>
    %49 = arith.mulf %47, %48 : vector<2x128xf32>
    %50 = arith.addf %44, %49 : vector<2x128xf32>
    %c0_25 = arith.constant 0 : index
    %c0_26 = arith.constant 0 : index
    %51 = vector.load %arg2[%c0_25, %c0_26] : memref<2x1xf32, #tpu.memory_space<vmem>>, vector<2x1xf32>
    %52 = vector.extract_strided_slice %26 {offsets = [4, 0], sizes = [1, 128], strides = [1, 1]} : vector<8x128xf32> to vector<1x128xf32>
    %53 = vector.broadcast %51 : vector<2x1xf32> to vector<2x128xf32>
    %54 = vector.broadcast %52 : vector<1x128xf32> to vector<2x128xf32>
    %55 = arith.mulf %53, %54 : vector<2x128xf32>
    %56 = arith.addf %50, %55 : vector<2x128xf32>
    %cst_27 = arith.constant 0.000000e+00 : f32
    %57 = vector.broadcast %cst_27 : f32 to vector<2x128xf32>
    %58 = arith.maximumf %56, %57 : vector<2x128xf32>
    %c0_28 = arith.constant 0 : index
    %c0_29 = arith.constant 0 : index
    %59 = vector.load %arg10[%c0_28, %c0_29] : memref<128x128xbf16, #tpu.memory_space<vmem>>, vector<128x128xbf16>
    %60 = arith.extf %59 : vector<128x128xbf16> to vector<128x128xf32>
    %cst_30 = arith.constant dense<0.000000e+00> : vector<2x128xf32>
    %61 = tpu.matmul %58, %60, %cst_30 {dimension_numbers = #tpu.dot_dimension_numbers<[1], [0], [0], [1], [0, 0, 1, 1], [], []>} : vector<2x128xf32>, vector<128x128xf32>, vector<2x128xf32> -> vector<2x128xf32>
    %c0_31 = arith.constant 0 : index
    %c0_32 = arith.constant 0 : index
    %62 = vector.load %arg11[%c0_31, %c0_32] : memref<1x128xf32, #tpu.memory_space<vmem>>, vector<1x128xf32>
    %63 = vector.broadcast %62 : vector<1x128xf32> to vector<2x128xf32>
    %64 = arith.addf %61, %63 : vector<2x128xf32>
    %c0_33 = arith.constant 0 : index
    %c0_34 = arith.constant 0 : index
    %65 = vector.load %arg14[%c0_33, %c0_34] : memref<2x128xf32, #tpu.memory_space<vmem>>, vector<2x128xf32>
    tpu.vector_store %arg14[%c0_33, %c0_34], %64 {strides = array<i32>} : memref<2x128xf32, #tpu.memory_space<vmem>>, vector<2x128xf32>,
    return
  }
}

</mosaic_0001>

<bundles_post_ra>
// kernel: sac_model_forward.1
= control target key start
LH: loop header
LB: loop body
LE: loop exit
PB: predicated region body
PF: predicated region fallthrough
CT: control target
= control target key end

     0   :  { %20 = vsyncpa [#allocation3], 0  ;;  %s4193_s0 = inlined_call_operand.vmem [shape: f32[2,1024], index: 0, kind: input, shape index: {}]   ;;  %s4194_s1 = inlined_call_operand.vmem [shape: f32[2,4], index: 1, kind: input, shape index: {}]   ;;  %s4195_s2 = inlined_call_operand.vmem [shape: f32[2,1], index: 2, kind: input, shape index: {}]   ;;  %s4196_s3 = inlined_call_operand.hbm [shape: bf16[1024,512], index: 3, kind: input, shape index: {}]   ;;  %s4197_s4 = inlined_call_operand.vmem [shape: f32[1,512], index: 4, kind: input, shape index: {}]   ;;  %s4198_s5 = inlined_call_operand.hbm [shape: bf16[512,128], index: 5, kind: input, shape index: {}]   ;;  %s4199_s6 = inlined_call_operand.vmem [shape: f32[1,128], index: 6, kind: input, shape index: {}]   ;;  %s4200_s7 = inlined_call_operand.vmem [shape: bf16[128,128], index: 7, kind: input, shape index: {}]   ;;  %s4201_s8 = inlined_call_operand.vmem [shape: f32[8,128], index: 8, kind: input, shape index: {}]   ;;  %s4202_s9 = inlined_call_operand.vmem [shape: f32[1,128], index: 9, kind: input, shape index: {}]   ;;  %s4203_s10 = inlined_call_operand.vmem [shape: bf16[128,128], index: 10, kind: input, shape index: {}]   ;;  %s4204_s11 = inlined_call_operand.vmem [shape: f32[1,128], index: 11, kind: input, shape index: {}]   ;;  %s4205_s12 = inlined_call_operand.hbm [shape: f32[2,512], index: 12, kind: output, shape index: {0}]   ;;  %s4206_s13 = inlined_call_operand.hbm [shape: f32[2,128], index: 13, kind: output, shape index: {1}]   ;;  %s4207_s14 = inlined_call_operand.vmem [shape: f32[2,128], index: 14, kind: output, shape index: {2}]  }
   0x1   :  { %21 = vsyncpa [#allocation6], 0 }
   0x2   :  { %22 = vsyncpa [#allocation4], 0 }
   0x3   :  { %23 = vsyncpa [#allocation9], 0  ;;  %s3905_s29 = smov [#allocation2]   ;;  %s3809_s17 = scalar_lea.hbm %s4196_s3, 32768 }
   0x4   :  { %s35_s30 = sshll.u32 %s3905_s29, 4  ;;  %p3810_p0 = scmp.ne.s32.totalorder %s4196_s3, %s3809_s17  ;;  %s36_s30 = int_to_ptr.vmem [resolvable:$true] %s35_s30 }
   0x5   :  { %p3813_p1 = scmp.lt.u32.totalorder %s3809_s17, %s4196_s3 }
   0x7   :  { %p3815_p2 = pnand %p3813_p1, %p3810_p0 }
   0x9   :  { %3818 = shalt.err (!%p3815_p2)
}
   0xa   :  { %s3819_s22 = scalar_lea.vmem %s36_s30, 32768  ;;  %p3824_p4 = scmp.lt.s32.totalorder %s36_s30, %s36_s30 }
   0xb   :  { %p3820_p3 = scmp.ne.s32.totalorder %s36_s30, %s3819_s22  ;;  %p3825_p5 = scmp.lt.s32.totalorder %s3819_s22, %s3819_s22 }
   0xd   :  { %p3826_p6 = por %p3825_p5, %p3824_p4 }
   0xf   :  { %p3827_p7 = pnand %p3826_p6, %p3820_p3 }
  0x11   :  { %3830 = shalt.err (!%p3827_p7)
}
  0x12   :  { %s3906_s23 = smov 256   ;;  %s3907_s24 = smov 16  }
  0x13   :  { %41 = dma.hbm_to_vmem [thread:$0]  %s4196_s3, 32768, %s36_s30, [#allocation3], %s3906_s23, %s3906_s23, %s3907_s24  }
  0x14   :  { %s3908_s27 = smov [#allocation5]   ;;  %s3831_s16 = scalar_lea.hbm %s4198_s5, 4096 }
  0x15   :  { %s49_s28 = sshll.u32 %s3908_s27, 4  ;;  %p3832_p8 = scmp.ne.s32.totalorder %s4198_s5, %s3831_s16  ;;  %s50_s28 = int_to_ptr.vmem [resolvable:$true] %s49_s28 }
  0x16   :  { %p3835_p9 = scmp.lt.u32.totalorder %s3831_s16, %s4198_s5 }
  0x18   :  { %p3837_p10 = pnand %p3835_p9, %p3832_p8 }
  0x1a   :  { %3840 = shalt.err (!%p3837_p10)
}
  0x1b   :  { %s3841_s21 = scalar_lea.vmem %s50_s28, 4096  ;;  %p3846_p12 = scmp.lt.s32.totalorder %s50_s28, %s50_s28 }
  0x1c   :  { %p3842_p11 = scmp.ne.s32.totalorder %s50_s28, %s3841_s21  ;;  %p3847_p13 = scmp.lt.s32.totalorder %s3841_s21, %s3841_s21 }
  0x1e   :  { %p3848_p0 = por %p3847_p13, %p3846_p12 }
  0x20   :  { %p3849_p1 = pnand %p3848_p0, %p3842_p11 }
  0x22   :  { %3852 = shalt.err (!%p3849_p1)
}
  0x23   :  { %s3909_s3 = smov 64   ;;  %s3910_s30 = smov 4  }
  0x24   :  { %55 = dma.hbm_to_vmem [thread:$0]  %s4198_s5, 4096, %s50_s28, [#allocation6], %s3909_s3, %s3909_s3, %s3910_s30  }
  0x25   :  { %3897 = dma.done.wait [#allocation3], 32768  }
  0x26   :  { %3898 = vsyncadd [#allocation3], 4294934528 }
  0x27   :  { %3899 = dma.done.wait [#allocation6], 4096  }
  0x28   :  { %3900 = vsyncadd [#allocation6], 4294963200  ;;  %v3423_v0 = vld [vmem:[#allocation2 + $0x4] ss:$16 sps:$4 sm:$0xff]   ;;  %v3425_v1 = vld [vmem:[#allocation2 + $0xc] ss:$16 sps:$4 sm:$0xff]   ;;  %v846_v36 = vlaneseq }
  0x29   :  { %2506 = vmatprep.subr.bf16.mxu0 %v3423_v0  ;;  %v3427_v2 = vld [vmem:[#allocation2] ss:$16 sps:$4 sm:$0xff]   ;;  %v3428_v3 = vld [vmem:[#allocation2 + $0x8] ss:$16 sps:$4 sm:$0xff]   ;;  %2762 = vmatprep.subr.bf16.mxu1 %v3425_v1  ;;  %v3429_v4 = vld [vmem:[#allocation2 + $0x24] ss:$16 sps:$4 sm:$0xff]  }
  0x2a   :  { %2508 = vmatpush1.bf16.msra.mxu0 %v3427_v2  ;;  %2764 = vmatpush1.bf16.msra.mxu1 %v3428_v3  ;;  %v3431_v5 = vld [vmem:[#allocation2 + $0x2c] ss:$16 sps:$4 sm:$0xff]   ;;  %v3433_v6 = vld [vmem:[#allocation2 + $0x20] ss:$16 sps:$4 sm:$0xff]   ;;  %v3434_v7 = vld [vmem:[#allocation2 + $0x28] ss:$16 sps:$4 sm:$0xff]  }
  0x2b   :  { %2510 = vmatprep.subr.bf16.mxu0 %v3429_v4  ;;  %2766 = vmatprep.subr.bf16.mxu1 %v3431_v5  ;;  %v3435_v8 = vld [vmem:[#allocation2 + $0x44] ss:$16 sps:$4 sm:$0xff]   ;;  %v3437_v9 = vld [vmem:[#allocation2 + $0x4c] ss:$16 sps:$4 sm:$0xff]   ;;  %v3439_v10 = vld [vmem:[#allocation2 + $0x40] ss:$16 sps:$4 sm:$0xff]  }
  0x2c   :  { %v3440_v11 = vld [vmem:[#allocation2 + $0x48] ss:$16 sps:$4 sm:$0xff]   ;;  %v3441_v12 = vld [vmem:[#allocation2 + $0x64] ss:$16 sps:$4 sm:$0xff]   ;;  %v3443_v13 = vld [vmem:[#allocation2 + $0x6c] ss:$16 sps:$4 sm:$0xff]  }
  0x2d   :  { %v3445_v14 = vld [vmem:[#allocation2 + $0x60] ss:$16 sps:$4 sm:$0xff]   ;;  %v3446_v15 = vld [vmem:[#allocation2 + $0x68] ss:$16 sps:$4 sm:$0xff]   ;;  %v3447_v16 = vld [vmem:[#allocation2 + $0x84] ss:$16 sps:$4 sm:$0xff]  }
  0x2e   :  { %2512 = vmatpush1.bf16.msra.mxu0 %v3433_v6  ;;  %2768 = vmatpush1.bf16.msra.mxu1 %v3434_v7  ;;  %v3449_v17 = vld [vmem:[#allocation2 + $0x8c] ss:$16 sps:$4 sm:$0xff]   ;;  %v3451_v18 = vld [vmem:[#allocation2 + $0x80] ss:$16 sps:$4 sm:$0xff]   ;;  %v3452_v19 = vld [vmem:[#allocation2 + $0x88] ss:$16 sps:$4 sm:$0xff]  }
  0x2f   :  { %2514 = vmatprep.subr.bf16.mxu0 %v3435_v8  ;;  %2770 = vmatprep.subr.bf16.mxu1 %v3437_v9  ;;  %v3453_v20 = vld [vmem:[#allocation2 + $0xa4] ss:$16 sps:$4 sm:$0xff]   ;;  %v3455_v21 = vld [vmem:[#allocation2 + $0xac] ss:$16 sps:$4 sm:$0xff]   ;;  %v3457_v22 = vld [vmem:[#allocation2 + $0xa0] ss:$16 sps:$4 sm:$0xff]  }
  0x30   :  { %v3458_v23 = vld [vmem:[#allocation2 + $0xa8] ss:$16 sps:$4 sm:$0xff]   ;;  %v3459_v24 = vld [vmem:[#allocation2 + $0xc4] ss:$16 sps:$4 sm:$0xff]   ;;  %v3461_v25 = vld [vmem:[#allocation2 + $0xcc] ss:$16 sps:$4 sm:$0xff]  }
  0x31   :  { %v3463_v26 = vld [vmem:[#allocation2 + $0xc0] ss:$16 sps:$4 sm:$0xff]   ;;  %v3464_v27 = vld [vmem:[#allocation2 + $0xc8] ss:$16 sps:$4 sm:$0xff]   ;;  %v3465_v28 = vld [vmem:[#allocation2 + $0xe4] ss:$16 sps:$4 sm:$0xff]  }
  0x32   :  { %2516 = vmatpush1.bf16.msra.mxu0 %v3439_v10  ;;  %2772 = vmatpush1.bf16.msra.mxu1 %v3440_v11  ;;  %v3467_v29 = vld [vmem:[#allocation2 + $0xec] ss:$16 sps:$4 sm:$0xff]   ;;  %v3469_v30 = vld [vmem:[#allocation2 + $0xe0] ss:$16 sps:$4 sm:$0xff]   ;;  %v3470_v31 = vld [vmem:[#allocation2 + $0xe8] ss:$16 sps:$4 sm:$0xff]  }
  0x33   :  { %2518 = vmatprep.subr.bf16.mxu0 %v3441_v12  ;;  %2774 = vmatprep.subr.bf16.mxu1 %v3443_v13  ;;  %v3471_v32 = vld [vmem:[#allocation2 + $0x104] ss:$16 sps:$4 sm:$0xff]   ;;  %v3473_v33 = vld [vmem:[#allocation2 + $0x10c] ss:$16 sps:$4 sm:$0xff]   ;;  %v3475_v34 = vld [vmem:[#allocation2 + $0x100] ss:$16 sps:$4 sm:$0xff]  }
  0x34   :  { %v3476_v35 = vld [vmem:[#allocation2 + $0x108] ss:$16 sps:$4 sm:$0xff]   ;;  %v3911_v37 = vmov 1983009808   ;;  %v3477_v39 = vld [vmem:[#allocation2 + $0x124] ss:$16 sps:$4 sm:$0xff]  }
  0x35   :  { %v870_v38 = vunpack.c.l.s4 %v3911_v37  ;;  %v3479_v40 = vld [vmem:[#allocation2 + $0x12c] ss:$16 sps:$4 sm:$0xff]   ;;  %v3481_v41 = vld [vmem:[#allocation2 + $0x120] ss:$16 sps:$4 sm:$0xff]   ;;  %v4020_v42 = vshrl.u32 %v846_v36, 7  ;;  %vm3913_vm0 = vmmov 0  }
  0x36   :  { %2520 = vmatpush1.bf16.msra.mxu0 %v3445_v14  ;;  %2776 = vmatpush1.bf16.msra.mxu1 %v3446_v15  ;;  %v3482_v44 = vld [vmem:[#allocation2 + $0x128] ss:$16 sps:$4 sm:$0xff]   ;;  %v3483_v45 = vld [vmem:[#allocation2 + $0x144] ss:$16 sps:$4 sm:$0xff]   ;;  %v3485_v46 = vld [vmem:[#allocation2 + $0x14c] ss:$16 sps:$4 sm:$0xff]  }
  0x37   :  { %2522 = vmatprep.subr.bf16.mxu0 %v3447_v16  ;;  %2778 = vmatprep.subr.bf16.mxu1 %v3449_v17  ;;  %v871_v43 = vunpack.c.0.s8 %v870_v38  ;;  %v3487_v47 = vld [vmem:[#allocation2 + $0x140] ss:$16 sps:$4 sm:$0xff]   ;;  %v3488_v48 = vld [vmem:[#allocation2 + $0x148] ss:$16 sps:$4 sm:$0xff]   ;;  %v3489_v50 = vld [vmem:[#allocation2 + $0x164] ss:$16 sps:$4 sm:$0xff]  }
  0x38   :  { %v3491_v51 = vld [vmem:[#allocation2 + $0x16c] ss:$16 sps:$4 sm:$0xff]   ;;  %v74_v52 = vld [vmem:[%s4193_s0] sm:$0xff]  ;;  %v3494_v55 = vld [vmem:[#allocation2 + $0x168] ss:$16 sps:$4 sm:$0xff]  }
  0x39   :  { %v4023_v49 = vsub.s32 %v871_v43, %v4020_v42  ;;  %v3493_v53 = vld [vmem:[#allocation2 + $0x160] ss:$16 sps:$4 sm:$0xff]   ;;  %v3495_v56 = vld [vmem:[#allocation2 + $0x184] ss:$16 sps:$4 sm:$0xff]   ;;  %v3497_v57 = vld [vmem:[#allocation2 + $0x18c] ss:$16 sps:$4 sm:$0xff]   ;;  %v868_v7 = vcombine.high %v74_v52, %v74_v52 }
  0x3a   :  { %2524 = vmatpush1.bf16.msra.mxu0 %v3451_v18  ;;  %2780 = vmatpush1.bf16.msra.mxu1 %v3452_v19  ;;  %v3499_v59 = vld [vmem:[#allocation2 + $0x180] ss:$16 sps:$4 sm:$0xff]   ;;  %v3500_v60 = vld [vmem:[#allocation2 + $0x188] ss:$16 sps:$4 sm:$0xff]   ;;  %v3501_v61 = vld [vmem:[#allocation2 + $0x1a4] ss:$16 sps:$4 sm:$0xff]  }
  0x3b   :  { %2526 = vmatprep.subr.bf16.mxu0 %v3453_v20  ;;  %2782 = vmatprep.subr.bf16.mxu1 %v3455_v21  ;;  %v875_v54 = vrot.slane %v74_v52, %v4023_v49  ;;  %v3503_v62 = vld [vmem:[#allocation2 + $0x1ac] ss:$16 sps:$4 sm:$0xff]   ;;  %v3505_v63 = vld [vmem:[#allocation2 + $0x1a0] ss:$16 sps:$4 sm:$0xff]   ;;  %v3506_v0 = vld [vmem:[#allocation2 + $0x1a8] ss:$16 sps:$4 sm:$0xff]   ;;  %v4030_v12 = vrot.slane %v868_v7, %v4023_v49 }
  0x3c   :  { %v3507_v1 = vld [vmem:[#allocation2 + $0x1c4] ss:$16 sps:$4 sm:$0xff]   ;;  %v3509_v2 = vld [vmem:[#allocation2 + $0x1cc] ss:$16 sps:$4 sm:$0xff]   ;;  %v3511_v3 = vld [vmem:[#allocation2 + $0x1c0] ss:$16 sps:$4 sm:$0xff]  }
  0x3d   :  { %v883_v58 = vcombine.high %v875_v54, %v875_v54  ;;  %v3512_v4 = vld [vmem:[#allocation2 + $0x1c8] ss:$16 sps:$4 sm:$0xff]   ;;  %v3513_v5 = vld [vmem:[#allocation2 + $0x1e4] ss:$16 sps:$4 sm:$0xff]   ;;  %v3515_v6 = vld [vmem:[#allocation2 + $0x1ec] ss:$16 sps:$4 sm:$0xff]   ;;  %v884_v17 = vcombine.high %v4030_v12, %v4030_v12 }
  0x3e   :  { %2528 = vmatpush1.bf16.msra.mxu0 %v3457_v22  ;;  %2784 = vmatpush1.bf16.msra.mxu1 %v3458_v23  ;;  %v3517_v8 = vld [vmem:[#allocation2 + $0x1e0] ss:$16 sps:$4 sm:$0xff]   ;;  %v3518_v9 = vld [vmem:[#allocation2 + $0x1e8] ss:$16 sps:$4 sm:$0xff]   ;;  %v3520_v10 = vld [vmem:[#allocation2 + $0x204] ss:$16 sps:$4 sm:$0xff]  }
  0x3f   :  { %2530 = vmatprep.subr.bf16.mxu0 %v3459_v24  ;;  %2786 = vmatprep.subr.bf16.mxu1 %v3461_v25  ;;  %v3523_v11 = vld [vmem:[#allocation2 + $0x20c] ss:$16 sps:$4 sm:$0xff]   ;;  %v3522_v13 = vld [vmem:[#allocation2 + $0x200] ss:$16 sps:$4 sm:$0xff]   ;;  %v3525_v14 = vld [vmem:[#allocation2 + $0x208] ss:$16 sps:$4 sm:$0xff]  }
  0x40   :  { %974 = vmatprep.mubr.f32.mxu0 %v883_v58  ;;  %1258 = vmatprep.mubr.f32.mxu1 %v883_v58  ;;  %v3526_v15 = vld [vmem:[#allocation2 + $0x224] ss:$16 sps:$4 sm:$0xff]   ;;  %v3529_v16 = vld [vmem:[#allocation2 + $0x22c] ss:$16 sps:$4 sm:$0xff]   ;;  %v3528_v18 = vld [vmem:[#allocation2 + $0x220] ss:$16 sps:$4 sm:$0xff]  }
  0x41   :  { %v3531_v19 = vld [vmem:[#allocation2 + $0x228] ss:$16 sps:$4 sm:$0xff]   ;;  %v3532_v20 = vld [vmem:[#allocation2 + $0x244] ss:$16 sps:$4 sm:$0xff]   ;;  %v3535_v21 = vld [vmem:[#allocation2 + $0x24c] ss:$16 sps:$4 sm:$0xff]  }
  0x42   :  { %2532 = vmatpush1.bf16.msra.mxu0 %v3463_v26  ;;  %2788 = vmatpush1.bf16.msra.mxu1 %v3464_v27  ;;  %v3534_v22 = vld [vmem:[#allocation2 + $0x240] ss:$16 sps:$4 sm:$0xff]   ;;  %v3537_v23 = vld [vmem:[#allocation2 + $0x248] ss:$16 sps:$4 sm:$0xff]   ;;  %v3538_v24 = vld [vmem:[#allocation2 + $0x264] ss:$16 sps:$4 sm:$0xff]  }
  0x43   :  { %2534 = vmatprep.subr.bf16.mxu0 %v3465_v28  ;;  %2790 = vmatprep.subr.bf16.mxu1 %v3467_v29  ;;  %v3541_v25 = vld [vmem:[#allocation2 + $0x26c] ss:$16 sps:$4 sm:$0xff]   ;;  %v3540_v26 = vld [vmem:[#allocation2 + $0x260] ss:$16 sps:$4 sm:$0xff]   ;;  %v3543_v27 = vld [vmem:[#allocation2 + $0x268] ss:$16 sps:$4 sm:$0xff]  }
  0x44   :  { %v3544_v28 = vld [vmem:[#allocation2 + $0x284] ss:$16 sps:$4 sm:$0xff]   ;;  %v3547_v29 = vld [vmem:[#allocation2 + $0x28c] ss:$16 sps:$4 sm:$0xff]   ;;  %v3558_v38 = vld [vmem:[#allocation2 + $0x2c0] ss:$16 sps:$4 sm:$0xff]  }
  0x45   :  { %v3556_v36 = vld [vmem:[#allocation2 + $0x2c4] ss:$16 sps:$4 sm:$0xff]   ;;  %v3559_v37 = vld [vmem:[#allocation2 + $0x2cc] ss:$16 sps:$4 sm:$0xff]   ;;  %v3564_v43 = vld [vmem:[#allocation2 + $0x2e0] ss:$16 sps:$4 sm:$0xff]  }
  0x46   :  { %2536 = vmatpush1.bf16.msra.mxu0 %v3469_v30  ;;  %2792 = vmatpush1.bf16.msra.mxu1 %v3470_v31  ;;  %v3546_v30 = vld [vmem:[#allocation2 + $0x280] ss:$16 sps:$4 sm:$0xff]   ;;  %v3549_v31 = vld [vmem:[#allocation2 + $0x288] ss:$16 sps:$4 sm:$0xff]   ;;  %v3586_v58 = vld [vmem:[#allocation2 + $0x364] ss:$16 sps:$4 sm:$0xff]  }
  0x47   :  { %2538 = vmatprep.subr.bf16.mxu0 %v3471_v32  ;;  %2794 = vmatprep.subr.bf16.mxu1 %v3473_v33  ;;  %v3550_v32 = vld [vmem:[#allocation2 + $0x2a4] ss:$16 sps:$4 sm:$0xff]   ;;  %v3553_v33 = vld [vmem:[#allocation2 + $0x2ac] ss:$16 sps:$4 sm:$0xff]   ;;  %v3576_v52 = vld [vmem:[#allocation2 + $0x320] ss:$16 sps:$4 sm:$0xff]  }
  0x48   :  { %v3607_v7 = vld [vmem:[#allocation2 + $0x3cc] ss:$16 sps:$4 sm:$0xff]  }
  0x4a   :  { %2540 = vmatpush1.bf16.msra.mxu0 %v3475_v34  ;;  %2796 = vmatpush1.bf16.msra.mxu1 %v3476_v35  ;;  %v3552_v34 = vld [vmem:[#allocation2 + $0x2a0] ss:$16 sps:$4 sm:$0xff]   ;;  %v3555_v35 = vld [vmem:[#allocation2 + $0x2a8] ss:$16 sps:$4 sm:$0xff]  }
  0x4b   :  { %2542 = vmatprep.subr.bf16.mxu0 %v3477_v39  ;;  %2798 = vmatprep.subr.bf16.mxu1 %v3479_v40  ;;  %v3561_v39 = vld [vmem:[#allocation2 + $0x2c8] ss:$16 sps:$4 sm:$0xff]   ;;  %v3562_v40 = vld [vmem:[#allocation2 + $0x2e4] ss:$16 sps:$4 sm:$0xff]  }
  0x4e   :  { %2544 = vmatpush1.bf16.msra.mxu0 %v3481_v41  ;;  %2800 = vmatpush1.bf16.msra.mxu1 %v3482_v44  ;;  %v3565_v41 = vld [vmem:[#allocation2 + $0x2ec] ss:$16 sps:$4 sm:$0xff]   ;;  %v3567_v44 = vld [vmem:[#allocation2 + $0x2e8] ss:$16 sps:$4 sm:$0xff]  }
  0x4f   :  { %2546 = vmatprep.subr.bf16.mxu0 %v3483_v45  ;;  %2802 = vmatprep.subr.bf16.mxu1 %v3485_v46  ;;  %v3568_v45 = vld [vmem:[#allocation2 + $0x304] ss:$16 sps:$4 sm:$0xff]   ;;  %v3571_v46 = vld [vmem:[#allocation2 + $0x30c] ss:$16 sps:$4 sm:$0xff]  }
  0x52   :  { %2548 = vmatpush1.bf16.msra.mxu0 %v3487_v47  ;;  %2804 = vmatpush1.bf16.msra.mxu1 %v3488_v48  ;;  %v3570_v47 = vld [vmem:[#allocation2 + $0x300] ss:$16 sps:$4 sm:$0xff]   ;;  %v3573_v48 = vld [vmem:[#allocation2 + $0x308] ss:$16 sps:$4 sm:$0xff]  }
  0x53   :  { %2550 = vmatprep.subr.bf16.mxu0 %v3489_v50  ;;  %2806 = vmatprep.subr.bf16.mxu1 %v3491_v51  ;;  %v3574_v50 = vld [vmem:[#allocation2 + $0x324] ss:$16 sps:$4 sm:$0xff]   ;;  %v3577_v51 = vld [vmem:[#allocation2 + $0x32c] ss:$16 sps:$4 sm:$0xff]  }
  0x56   :  { %2552 = vmatpush1.bf16.msra.mxu0 %v3493_v53  ;;  %2808 = vmatpush1.bf16.msra.mxu1 %v3494_v55  ;;  %v3579_v53 = vld [vmem:[#allocation2 + $0x328] ss:$16 sps:$4 sm:$0xff]   ;;  %v3583_v55 = vld [vmem:[#allocation2 + $0x34c] ss:$16 sps:$4 sm:$0xff]  }
  0x57   :  { %2554 = vmatprep.subr.bf16.mxu0 %v3495_v56  ;;  %2810 = vmatprep.subr.bf16.mxu1 %v3497_v57  ;;  %v3582_v56 = vld [vmem:[#allocation2 + $0x340] ss:$16 sps:$4 sm:$0xff]   ;;  %v3585_v57 = vld [vmem:[#allocation2 + $0x348] ss:$16 sps:$4 sm:$0xff]  }
  0x5a   :  { %2556 = vmatpush1.bf16.msra.mxu0 %v3499_v59  ;;  %2812 = vmatpush1.bf16.msra.mxu1 %v3500_v60  ;;  %v3589_v59 = vld [vmem:[#allocation2 + $0x36c] ss:$16 sps:$4 sm:$0xff]   ;;  %v3588_v60 = vld [vmem:[#allocation2 + $0x360] ss:$16 sps:$4 sm:$0xff]  }
  0x5b   :  { %2558 = vmatprep.subr.bf16.mxu0 %v3501_v61  ;;  %2814 = vmatprep.subr.bf16.mxu1 %v3503_v62  ;;  %v3591_v61 = vld [vmem:[#allocation2 + $0x368] ss:$16 sps:$4 sm:$0xff]   ;;  %v3592_v62 = vld [vmem:[#allocation2 + $0x384] ss:$16 sps:$4 sm:$0xff]  }
  0x5e   :  { %2560 = vmatpush1.bf16.msra.mxu0 %v3505_v63  ;;  %2816 = vmatpush1.bf16.msra.mxu1 %v3506_v0  ;;  %v3595_v63 = vld [vmem:[#allocation2 + $0x38c] ss:$16 sps:$4 sm:$0xff]   ;;  %v3594_v0 = vld [vmem:[#allocation2 + $0x380] ss:$16 sps:$4 sm:$0xff]  }
  0x5f   :  { %2562 = vmatprep.subr.bf16.mxu0 %v3507_v1  ;;  %2818 = vmatprep.subr.bf16.mxu1 %v3509_v2  ;;  %v3597_v1 = vld [vmem:[#allocation2 + $0x388] ss:$16 sps:$4 sm:$0xff]   ;;  %v3598_v2 = vld [vmem:[#allocation2 + $0x3a4] ss:$16 sps:$4 sm:$0xff]  }
  0x62   :  { %2564 = vmatpush1.bf16.msra.mxu0 %v3511_v3  ;;  %2820 = vmatpush1.bf16.msra.mxu1 %v3512_v4  ;;  %v3601_v3 = vld [vmem:[#allocation2 + $0x3ac] ss:$16 sps:$4 sm:$0xff]   ;;  %v3600_v4 = vld [vmem:[#allocation2 + $0x3a0] ss:$16 sps:$4 sm:$0xff]  }
  0x63   :  { %2566 = vmatprep.subr.bf16.mxu0 %v3513_v5  ;;  %2822 = vmatprep.subr.bf16.mxu1 %v3515_v6  ;;  %v3603_v5 = vld [vmem:[#allocation2 + $0x3a8] ss:$16 sps:$4 sm:$0xff]   ;;  %v3604_v6 = vld [vmem:[#allocation2 + $0x3c4] ss:$16 sps:$4 sm:$0xff]  }
  0x66   :  { %2568 = vmatpush1.bf16.msra.mxu0 %v3517_v8  ;;  %2824 = vmatpush1.bf16.msra.mxu1 %v3518_v9  ;;  %v3606_v8 = vld [vmem:[#allocation2 + $0x3c0] ss:$16 sps:$4 sm:$0xff]   ;;  %v3609_v9 = vld [vmem:[#allocation2 + $0x3c8] ss:$16 sps:$4 sm:$0xff]  }
  0x67   :  { %2570 = vmatprep.subr.bf16.mxu0 %v3520_v10  ;;  %2826 = vmatprep.subr.bf16.mxu1 %v3523_v11  ;;  %v3610_v10 = vld [vmem:[#allocation2 + $0x3e4] ss:$16 sps:$4 sm:$0xff]   ;;  %v3613_v11 = vld [vmem:[#allocation2 + $0x3ec] ss:$16 sps:$4 sm:$0xff]  }
  0x69   :  { %975 = vmatmul.mubr.f32.vlgmr.msra.gmra.mrb[0].mxu0 %v875_v54  ;;  %1259 = vmatmul.mubr.f32.vlgmr.msra.gmra.mrb[0].mxu1 %v875_v54  ;;  %v3580_v54 = vld [vmem:[#allocation2 + $0x344] ss:$16 sps:$4 sm:$0xff]  }
  0x6a   :  { %2572 = vmatpush1.bf16.msra.mxu0 %v3522_v13  ;;  %2828 = vmatpush1.bf16.msra.mxu1 %v3525_v14  ;;  %v3612_v13 = vld [vmem:[#allocation2 + $0x3e0] ss:$16 sps:$4 sm:$0xff]   ;;  %v3615_v14 = vld [vmem:[#allocation2 + $0x3e8] ss:$16 sps:$4 sm:$0xff]  }
  0x6b   :  { %2574 = vmatprep.subr.bf16.mxu0 %v3526_v15  ;;  %2830 = vmatprep.subr.bf16.mxu1 %v3529_v16  ;;  %v3616_v15 = vld [vmem:[#allocation2 + $0x404] ss:$16 sps:$4 sm:$0xff]   ;;  %v3619_v16 = vld [vmem:[#allocation2 + $0x40c] ss:$16 sps:$4 sm:$0xff]  }
  0x6c   :  { %1045 = vmatprep.mubr.f32.mxu0 %v884_v17  ;;  %1329 = vmatprep.mubr.f32.mxu1 %v884_v17  ;;  %v3618_v17 = vld [vmem:[#allocation2 + $0x400] ss:$16 sps:$4 sm:$0xff]  }
  0x6e   :  { %2576 = vmatpush1.bf16.msra.mxu0 %v3528_v18  ;;  %2832 = vmatpush1.bf16.msra.mxu1 %v3531_v19  ;;  %v3621_v18 = vld [vmem:[#allocation2 + $0x408] ss:$16 sps:$4 sm:$0xff]  }
  0x6f   :  { %2578 = vmatprep.subr.bf16.mxu0 %v3532_v20  ;;  %2834 = vmatprep.subr.bf16.mxu1 %v3535_v21  ;;  %v4037_v19 = vld [vmem:[%s4193_s0 + $0x8] sm:$0xff]  ;;  %v3622_v20 = vld [vmem:[#allocation2 + $0x424] ss:$16 sps:$4 sm:$0xff]  }
  0x70   :  { %v3625_v21 = vld [vmem:[#allocation2 + $0x42c] ss:$16 sps:$4 sm:$0xff]  }
  0x72   :  { %2580 = vmatpush1.bf16.msra.mxu0 %v3534_v22  ;;  %2836 = vmatpush1.bf16.msra.mxu1 %v3537_v23  ;;  %v4041_v22 = vrot.slane %v4037_v19, %v4023_v49 }
  0x73   :  { %2582 = vmatprep.subr.bf16.mxu0 %v3538_v24  ;;  %2838 = vmatprep.subr.bf16.mxu1 %v3541_v25  ;;  %v3624_v24 = vld [vmem:[#allocation2 + $0x420] ss:$16 sps:$4 sm:$0xff]   ;;  %v3627_v25 = vld [vmem:[#allocation2 + $0x428] ss:$16 sps:$4 sm:$0xff]  }
  0x74   :  { %v900_v23 = vcombine.high %v4041_v22, %v4041_v22 }
  0x76   :  { %2584 = vmatpush1.bf16.msra.mxu0 %v3540_v26  ;;  %2840 = vmatpush1.bf16.msra.mxu1 %v3543_v27  ;;  %v3628_v26 = vld [vmem:[#allocation2 + $0x444] ss:$16 sps:$4 sm:$0xff]   ;;  %v3631_v27 = vld [vmem:[#allocation2 + $0x44c] ss:$16 sps:$4 sm:$0xff]  }
  0x77   :  { %2586 = vmatprep.subr.bf16.mxu0 %v3544_v28  ;;  %2842 = vmatprep.subr.bf16.mxu1 %v3547_v29  ;;  %v3630_v28 = vld [vmem:[#allocation2 + $0x440] ss:$16 sps:$4 sm:$0xff]   ;;  %v3633_v29 = vld [vmem:[#allocation2 + $0x448] ss:$16 sps:$4 sm:$0xff]  }
  0x7a   :  { %2588 = vmatpush1.bf16.msra.mxu0 %v3546_v30  ;;  %2844 = vmatpush1.bf16.msra.mxu1 %v3549_v31  ;;  %v3637_v30 = vld [vmem:[#allocation2 + $0x46c] ss:$16 sps:$4 sm:$0xff]   ;;  %v3636_v31 = vld [vmem:[#allocation2 + $0x460] ss:$16 sps:$4 sm:$0xff]  }
  0x7b   :  { %2590 = vmatprep.subr.bf16.mxu0 %v3550_v32  ;;  %2846 = vmatprep.subr.bf16.mxu1 %v3553_v33  ;;  %v3639_v32 = vld [vmem:[#allocation2 + $0x468] ss:$16 sps:$4 sm:$0xff]   ;;  %v3640_v33 = vld [vmem:[#allocation2 + $0x484] ss:$16 sps:$4 sm:$0xff]  }
  0x7e   :  { %2592 = vmatpush1.bf16.msra.mxu0 %v3552_v34  ;;  %2848 = vmatpush1.bf16.msra.mxu1 %v3555_v35  ;;  %v3643_v34 = vld [vmem:[#allocation2 + $0x48c] ss:$16 sps:$4 sm:$0xff]   ;;  %v3642_v35 = vld [vmem:[#allocation2 + $0x480] ss:$16 sps:$4 sm:$0xff]  }
  0x7f   :  { %2594 = vmatprep.subr.bf16.mxu0 %v3556_v36  ;;  %2850 = vmatprep.subr.bf16.mxu1 %v3559_v37  ;;  %v3645_v36 = vld [vmem:[#allocation2 + $0x488] ss:$16 sps:$4 sm:$0xff]   ;;  %v3646_v37 = vld [vmem:[#allocation2 + $0x4a4] ss:$16 sps:$4 sm:$0xff]  }
  0x82   :  { %2596 = vmatpush1.bf16.msra.mxu0 %v3558_v38  ;;  %2852 = vmatpush1.bf16.msra.mxu1 %v3561_v39  ;;  %v3649_v38 = vld [vmem:[#allocation2 + $0x4ac] ss:$16 sps:$4 sm:$0xff]   ;;  %v3648_v39 = vld [vmem:[#allocation2 + $0x4a0] ss:$16 sps:$4 sm:$0xff]  }
  0x83   :  { %2598 = vmatprep.subr.bf16.mxu0 %v3562_v40  ;;  %2854 = vmatprep.subr.bf16.mxu1 %v3565_v41  ;;  %v3651_v40 = vld [vmem:[#allocation2 + $0x4a8] ss:$16 sps:$4 sm:$0xff]   ;;  %v3652_v41 = vld [vmem:[#allocation2 + $0x4c4] ss:$16 sps:$4 sm:$0xff]  }
  0x86   :  { %2600 = vmatpush1.bf16.msra.mxu0 %v3564_v43  ;;  %2856 = vmatpush1.bf16.msra.mxu1 %v3567_v44  ;;  %v3655_v43 = vld [vmem:[#allocation2 + $0x4cc] ss:$16 sps:$4 sm:$0xff]   ;;  %v3654_v44 = vld [vmem:[#allocation2 + $0x4c0] ss:$16 sps:$4 sm:$0xff]  }
  0x87   :  { %2602 = vmatprep.subr.bf16.mxu0 %v3568_v45  ;;  %2858 = vmatprep.subr.bf16.mxu1 %v3571_v46  ;;  %v3657_v45 = vld [vmem:[#allocation2 + $0x4c8] ss:$16 sps:$4 sm:$0xff]   ;;  %v3658_v46 = vld [vmem:[#allocation2 + $0x4e4] ss:$16 sps:$4 sm:$0xff]  }
  0x8a   :  { %2604 = vmatpush1.bf16.msra.mxu0 %v3570_v47  ;;  %2860 = vmatpush1.bf16.msra.mxu1 %v3573_v48  ;;  %v3661_v47 = vld [vmem:[#allocation2 + $0x4ec] ss:$16 sps:$4 sm:$0xff]   ;;  %v3660_v48 = vld [vmem:[#allocation2 + $0x4e0] ss:$16 sps:$4 sm:$0xff]  }
  0x8b   :  { %2606 = vmatprep.subr.bf16.mxu0 %v3574_v50  ;;  %2862 = vmatprep.subr.bf16.mxu1 %v3577_v51  ;;  %v3663_v50 = vld [vmem:[#allocation2 + $0x4e8] ss:$16 sps:$4 sm:$0xff]   ;;  %v3664_v51 = vld [vmem:[#allocation2 + $0x504] ss:$16 sps:$4 sm:$0xff]  }
  0x8e   :  { %2608 = vmatpush1.bf16.msra.mxu0 %v3576_v52  ;;  %2864 = vmatpush1.bf16.msra.mxu1 %v3579_v53  ;;  %v3667_v52 = vld [vmem:[#allocation2 + $0x50c] ss:$16 sps:$4 sm:$0xff]   ;;  %v3666_v53 = vld [vmem:[#allocation2 + $0x500] ss:$16 sps:$4 sm:$0xff]  }
  0x8f   :  { %2610 = vmatprep.subr.bf16.mxu0 %v3580_v54  ;;  %2866 = vmatprep.subr.bf16.mxu1 %v3583_v55  ;;  %v3669_v54 = vld [vmem:[#allocation2 + $0x508] ss:$16 sps:$4 sm:$0xff]   ;;  %v3670_v55 = vld [vmem:[#allocation2 + $0x524] ss:$16 sps:$4 sm:$0xff]  }
  0x92   :  { %2612 = vmatpush1.bf16.msra.mxu0 %v3582_v56  ;;  %2868 = vmatpush1.bf16.msra.mxu1 %v3585_v57  ;;  %v3673_v56 = vld [vmem:[#allocation2 + $0x52c] ss:$16 sps:$4 sm:$0xff]   ;;  %v3672_v57 = vld [vmem:[#allocation2 + $0x520] ss:$16 sps:$4 sm:$0xff]  }
  0x93   :  { %2614 = vmatprep.subr.bf16.mxu0 %v3586_v58  ;;  %2870 = vmatprep.subr.bf16.mxu1 %v3589_v59  ;;  %v3675_v58 = vld [vmem:[#allocation2 + $0x528] ss:$16 sps:$4 sm:$0xff]   ;;  %v3676_v59 = vld [vmem:[#allocation2 + $0x544] ss:$16 sps:$4 sm:$0xff]  }
  0x96   :  { %2616 = vmatpush1.bf16.msra.mxu0 %v3588_v60  ;;  %2872 = vmatpush1.bf16.msra.mxu1 %v3591_v61  ;;  %v3679_v60 = vld [vmem:[#allocation2 + $0x54c] ss:$16 sps:$4 sm:$0xff]   ;;  %v3678_v61 = vld [vmem:[#allocation2 + $0x540] ss:$16 sps:$4 sm:$0xff]  }
  0x97   :  { %2618 = vmatprep.subr.bf16.mxu0 %v3592_v62  ;;  %2874 = vmatprep.subr.bf16.mxu1 %v3595_v63  ;;  %v3681_v62 = vld [vmem:[#allocation2 + $0x548] ss:$16 sps:$4 sm:$0xff]   ;;  %v3682_v63 = vld [vmem:[#allocation2 + $0x564] ss:$16 sps:$4 sm:$0xff]  }
  0x9a   :  { %2620 = vmatpush1.bf16.msra.mxu0 %v3594_v0  ;;  %2876 = vmatpush1.bf16.msra.mxu1 %v3597_v1  ;;  %v3685_v0 = vld [vmem:[#allocation2 + $0x56c] ss:$16 sps:$4 sm:$0xff]   ;;  %v3684_v1 = vld [vmem:[#allocation2 + $0x560] ss:$16 sps:$4 sm:$0xff]  }
  0x9b   :  { %2622 = vmatprep.subr.bf16.mxu0 %v3598_v2  ;;  %2878 = vmatprep.subr.bf16.mxu1 %v3601_v3  ;;  %v3687_v2 = vld [vmem:[#allocation2 + $0x568] ss:$16 sps:$4 sm:$0xff]   ;;  %v3688_v3 = vld [vmem:[#allocation2 + $0x584] ss:$16 sps:$4 sm:$0xff]  }
  0x9e   :  { %2624 = vmatpush1.bf16.msra.mxu0 %v3600_v4  ;;  %2880 = vmatpush1.bf16.msra.mxu1 %v3603_v5  ;;  %v3691_v4 = vld [vmem:[#allocation2 + $0x58c] ss:$16 sps:$4 sm:$0xff]   ;;  %v3690_v5 = vld [vmem:[#allocation2 + $0x580] ss:$16 sps:$4 sm:$0xff]  }
  0x9f   :  { %2626 = vmatprep.subr.bf16.mxu0 %v3604_v6  ;;  %2882 = vmatprep.subr.bf16.mxu1 %v3607_v7  ;;  %v3693_v6 = vld [vmem:[#allocation2 + $0x588] ss:$16 sps:$4 sm:$0xff]   ;;  %v3694_v7 = vld [vmem:[#allocation2 + $0x5a4] ss:$16 sps:$4 sm:$0xff]  }
  0xa2   :  { %2628 = vmatpush1.bf16.msra.mxu0 %v3606_v8  ;;  %2884 = vmatpush1.bf16.msra.mxu1 %v3609_v9  ;;  %v3697_v8 = vld [vmem:[#allocation2 + $0x5ac] ss:$16 sps:$4 sm:$0xff]   ;;  %v3696_v9 = vld [vmem:[#allocation2 + $0x5a0] ss:$16 sps:$4 sm:$0xff]  }
  0xa3   :  { %2630 = vmatprep.subr.bf16.mxu0 %v3610_v10  ;;  %2886 = vmatprep.subr.bf16.mxu1 %v3613_v11  ;;  %v3699_v10 = vld [vmem:[#allocation2 + $0x5a8] ss:$16 sps:$4 sm:$0xff]   ;;  %v3700_v11 = vld [vmem:[#allocation2 + $0x5c4] ss:$16 sps:$4 sm:$0xff]  }
  0xa6   :  { %2632 = vmatpush1.bf16.msra.mxu0 %v3612_v13  ;;  %2888 = vmatpush1.bf16.msra.mxu1 %v3615_v14  ;;  %v3703_v13 = vld [vmem:[#allocation2 + $0x5cc] ss:$16 sps:$4 sm:$0xff]   ;;  %v3702_v14 = vld [vmem:[#allocation2 + $0x5c0] ss:$16 sps:$4 sm:$0xff]  }
  0xa7   :  { %2634 = vmatprep.subr.bf16.mxu0 %v3616_v15  ;;  %2890 = vmatprep.subr.bf16.mxu1 %v3619_v16  ;;  %v3705_v15 = vld [vmem:[#allocation2 + $0x5c8] ss:$16 sps:$4 sm:$0xff]   ;;  %v3706_v16 = vld [vmem:[#allocation2 + $0x5e4] ss:$16 sps:$4 sm:$0xff]  }
  0xa9   :  { %1046 = vmatmul.mubr.f32.vlgmr.msra.gmra.mrb[0].mxu0 %v4030_v12  ;;  %1330 = vmatmul.mubr.f32.vlgmr.msra.gmra.mrb[0].mxu1 %v4030_v12  ;;  %v3634_v12 = vld [vmem:[#allocation2 + $0x464] ss:$16 sps:$4 sm:$0xff]  }
  0xaa   :  { %2636 = vmatpush1.bf16.msra.mxu0 %v3618_v17  ;;  %2892 = vmatpush1.bf16.msra.mxu1 %v3621_v18  ;;  %v3709_v17 = vld [vmem:[#allocation2 + $0x5ec] ss:$16 sps:$4 sm:$0xff]   ;;  %v885_v18 = vcombine.high %v4037_v19, %v4037_v19 }
  0xab   :  { %2638 = vmatprep.subr.bf16.mxu0 %v3622_v20  ;;  %2894 = vmatprep.subr.bf16.mxu1 %v3625_v21  ;;  %v3708_v20 = vld [vmem:[#allocation2 + $0x5e0] ss:$16 sps:$4 sm:$0xff]   ;;  %v3711_v21 = vld [vmem:[#allocation2 + $0x5e8] ss:$16 sps:$4 sm:$0xff]  }
  0xac   :  { %1116 = vmatprep.mubr.f32.mxu0 %v900_v23  ;;  %1400 = vmatprep.mubr.f32.mxu1 %v900_v23  ;;  %v3712_v23 = vld [vmem:[#allocation2 + $0x604] ss:$16 sps:$4 sm:$0xff]  }
  0xae   :  { %2640 = vmatpush1.bf16.msra.mxu0 %v3624_v24  ;;  %2896 = vmatpush1.bf16.msra.mxu1 %v3627_v25  ;;  %v3715_v24 = vld [vmem:[#allocation2 + $0x60c] ss:$16 sps:$4 sm:$0xff]   ;;  %v4050_v25 = vrot.slane %v885_v18, %v4023_v49 }
  0xaf   :  { %2642 = vmatprep.subr.bf16.mxu0 %v3628_v26  ;;  %2898 = vmatprep.subr.bf16.mxu1 %v3631_v27  ;;  %v3714_v26 = vld [vmem:[#allocation2 + $0x600] ss:$16 sps:$4 sm:$0xff]   ;;  %v3717_v27 = vld [vmem:[#allocation2 + $0x608] ss:$16 sps:$4 sm:$0xff]   ;;  %v3799_v18 = vld [vmem:[#allocation2 + $0x7cc] ss:$16 sps:$4 sm:$0xff]  }
  0xb0   :  { %v901_v19 = vcombine.high %v4050_v25, %v4050_v25 }
  0xb2   :  { %2644 = vmatpush1.bf16.msra.mxu0 %v3630_v28  ;;  %2900 = vmatpush1.bf16.msra.mxu1 %v3633_v29  ;;  %v3718_v28 = vld [vmem:[#allocation2 + $0x624] ss:$16 sps:$4 sm:$0xff]   ;;  %v3721_v29 = vld [vmem:[#allocation2 + $0x62c] ss:$16 sps:$4 sm:$0xff]  }
  0xb3   :  { %2646 = vmatprep.subr.bf16.mxu0 %v3634_v12  ;;  %2902 = vmatprep.subr.bf16.mxu1 %v3637_v30  ;;  %v3720_v12 = vld [vmem:[#allocation2 + $0x620] ss:$16 sps:$4 sm:$0xff]   ;;  %v3723_v30 = vld [vmem:[#allocation2 + $0x628] ss:$16 sps:$4 sm:$0xff]  }
  0xb6   :  { %2648 = vmatpush1.bf16.msra.mxu0 %v3636_v31  ;;  %2904 = vmatpush1.bf16.msra.mxu1 %v3639_v32  ;;  %v3724_v31 = vld [vmem:[#allocation2 + $0x644] ss:$16 sps:$4 sm:$0xff]   ;;  %v3727_v32 = vld [vmem:[#allocation2 + $0x64c] ss:$16 sps:$4 sm:$0xff]  }
  0xb7   :  { %2650 = vmatprep.subr.bf16.mxu0 %v3640_v33  ;;  %2906 = vmatprep.subr.bf16.mxu1 %v3643_v34  ;;  %v3726_v33 = vld [vmem:[#allocation2 + $0x640] ss:$16 sps:$4 sm:$0xff]   ;;  %v3729_v34 = vld [vmem:[#allocation2 + $0x648] ss:$16 sps:$4 sm:$0xff]  }
  0xba   :  { %2652 = vmatpush1.bf16.msra.mxu0 %v3642_v35  ;;  %2908 = vmatpush1.bf16.msra.mxu1 %v3645_v36  ;;  %v3730_v35 = vld [vmem:[#allocation2 + $0x664] ss:$16 sps:$4 sm:$0xff]   ;;  %v3733_v36 = vld [vmem:[#allocation2 + $0x66c] ss:$16 sps:$4 sm:$0xff]  }
  0xbb   :  { %2654 = vmatprep.subr.bf16.mxu0 %v3646_v37  ;;  %2910 = vmatprep.subr.bf16.mxu1 %v3649_v38  ;;  %v3735_v37 = vld [vmem:[#allocation2 + $0x668] ss:$16 sps:$4 sm:$0xff]   ;;  %v3736_v38 = vld [vmem:[#allocation2 + $0x684] ss:$16 sps:$4 sm:$0xff]  }
  0xbe   :  { %2656 = vmatpush1.bf16.msra.mxu0 %v3648_v39  ;;  %2912 = vmatpush1.bf16.msra.mxu1 %v3651_v40  ;;  %v3739_v39 = vld [vmem:[#allocation2 + $0x68c] ss:$16 sps:$4 sm:$0xff]   ;;  %v3738_v40 = vld [vmem:[#allocation2 + $0x680] ss:$16 sps:$4 sm:$0xff]  }
  0xbf   :  { %2658 = vmatprep.subr.bf16.mxu0 %v3652_v41  ;;  %2914 = vmatprep.subr.bf16.mxu1 %v3655_v43  ;;  %v3741_v41 = vld [vmem:[#allocation2 + $0x688] ss:$16 sps:$4 sm:$0xff]   ;;  %v3742_v43 = vld [vmem:[#allocation2 + $0x6a4] ss:$16 sps:$4 sm:$0xff]  }
  0xc2   :  { %2660 = vmatpush1.bf16.msra.mxu0 %v3654_v44  ;;  %2916 = vmatpush1.bf16.msra.mxu1 %v3657_v45  ;;  %v3745_v44 = vld [vmem:[#allocation2 + $0x6ac] ss:$16 sps:$4 sm:$0xff]   ;;  %v3744_v45 = vld [vmem:[#allocation2 + $0x6a0] ss:$16 sps:$4 sm:$0xff]  }
  0xc3   :  { %2662 = vmatprep.subr.bf16.mxu0 %v3658_v46  ;;  %2918 = vmatprep.subr.bf16.mxu1 %v3661_v47  ;;  %v3747_v46 = vld [vmem:[#allocation2 + $0x6a8] ss:$16 sps:$4 sm:$0xff]   ;;  %v3748_v47 = vld [vmem:[#allocation2 + $0x6c4] ss:$16 sps:$4 sm:$0xff]  }
  0xc6   :  { %2664 = vmatpush1.bf16.msra.mxu0 %v3660_v48  ;;  %2920 = vmatpush1.bf16.msra.mxu1 %v3663_v50  ;;  %v3751_v48 = vld [vmem:[#allocation2 + $0x6cc] ss:$16 sps:$4 sm:$0xff]   ;;  %v3750_v50 = vld [vmem:[#allocation2 + $0x6c0] ss:$16 sps:$4 sm:$0xff]  }
  0xc7   :  { %2666 = vmatprep.subr.bf16.mxu0 %v3664_v51  ;;  %2922 = vmatprep.subr.bf16.mxu1 %v3667_v52  ;;  %v3753_v51 = vld [vmem:[#allocation2 + $0x6c8] ss:$16 sps:$4 sm:$0xff]   ;;  %v3754_v52 = vld [vmem:[#allocation2 + $0x6e4] ss:$16 sps:$4 sm:$0xff]  }
  0xca   :  { %2668 = vmatpush1.bf16.msra.mxu0 %v3666_v53  ;;  %2924 = vmatpush1.bf16.msra.mxu1 %v3669_v54  ;;  %v3757_v53 = vld [vmem:[#allocation2 + $0x6ec] ss:$16 sps:$4 sm:$0xff]   ;;  %v3756_v54 = vld [vmem:[#allocation2 + $0x6e0] ss:$16 sps:$4 sm:$0xff]  }
  0xcb   :  { %2670 = vmatprep.subr.bf16.mxu0 %v3670_v55  ;;  %2926 = vmatprep.subr.bf16.mxu1 %v3673_v56  ;;  %v3759_v55 = vld [vmem:[#allocation2 + $0x6e8] ss:$16 sps:$4 sm:$0xff]   ;;  %v3760_v56 = vld [vmem:[#allocation2 + $0x704] ss:$16 sps:$4 sm:$0xff]  }
  0xce   :  { %2672 = vmatpush1.bf16.msra.mxu0 %v3672_v57  ;;  %2928 = vmatpush1.bf16.msra.mxu1 %v3675_v58  ;;  %v3763_v57 = vld [vmem:[#allocation2 + $0x70c] ss:$16 sps:$4 sm:$0xff]   ;;  %v3762_v58 = vld [vmem:[#allocation2 + $0x700] ss:$16 sps:$4 sm:$0xff]  }
  0xcf   :  { %2674 = vmatprep.subr.bf16.mxu0 %v3676_v59  ;;  %2930 = vmatprep.subr.bf16.mxu1 %v3679_v60  ;;  %v3765_v59 = vld [vmem:[#allocation2 + $0x708] ss:$16 sps:$4 sm:$0xff]   ;;  %v3766_v60 = vld [vmem:[#allocation2 + $0x724] ss:$16 sps:$4 sm:$0xff]  }
  0xd2   :  { %2676 = vmatpush1.bf16.msra.mxu0 %v3678_v61  ;;  %2932 = vmatpush1.bf16.msra.mxu1 %v3681_v62  ;;  %v3769_v61 = vld [vmem:[#allocation2 + $0x72c] ss:$16 sps:$4 sm:$0xff]   ;;  %v3768_v62 = vld [vmem:[#allocation2 + $0x720] ss:$16 sps:$4 sm:$0xff]  }
  0xd3   :  { %2678 = vmatprep.subr.bf16.mxu0 %v3682_v63  ;;  %2934 = vmatprep.subr.bf16.mxu1 %v3685_v0  ;;  %v3771_v63 = vld [vmem:[#allocation2 + $0x728] ss:$16 sps:$4 sm:$0xff]   ;;  %v3772_v0 = vld [vmem:[#allocation2 + $0x744] ss:$16 sps:$4 sm:$0xff]  }
  0xd6   :  { %2680 = vmatpush1.bf16.msra.mxu0 %v3684_v1  ;;  %2936 = vmatpush1.bf16.msra.mxu1 %v3687_v2  ;;  %v3775_v1 = vld [vmem:[#allocation2 + $0x74c] ss:$16 sps:$4 sm:$0xff]   ;;  %v3774_v2 = vld [vmem:[#allocation2 + $0x740] ss:$16 sps:$4 sm:$0xff]  }
  0xd7   :  { %2682 = vmatprep.subr.bf16.mxu0 %v3688_v3  ;;  %2938 = vmatprep.subr.bf16.mxu1 %v3691_v4  ;;  %v3777_v3 = vld [vmem:[#allocation2 + $0x748] ss:$16 sps:$4 sm:$0xff]   ;;  %v3778_v4 = vld [vmem:[#allocation2 + $0x764] ss:$16 sps:$4 sm:$0xff]  }
  0xda   :  { %2684 = vmatpush1.bf16.msra.mxu0 %v3690_v5  ;;  %2940 = vmatpush1.bf16.msra.mxu1 %v3693_v6  ;;  %v3781_v5 = vld [vmem:[#allocation2 + $0x76c] ss:$16 sps:$4 sm:$0xff]   ;;  %v3780_v6 = vld [vmem:[#allocation2 + $0x760] ss:$16 sps:$4 sm:$0xff]  }
  0xdb   :  { %2686 = vmatprep.subr.bf16.mxu0 %v3694_v7  ;;  %2942 = vmatprep.subr.bf16.mxu1 %v3697_v8  ;;  %v3783_v7 = vld [vmem:[#allocation2 + $0x768] ss:$16 sps:$4 sm:$0xff]   ;;  %v3784_v8 = vld [vmem:[#allocation2 + $0x784] ss:$16 sps:$4 sm:$0xff]  }
  0xde   :  { %2688 = vmatpush1.bf16.msra.mxu0 %v3696_v9  ;;  %2944 = vmatpush1.bf16.msra.mxu1 %v3699_v10  ;;  %v3787_v9 = vld [vmem:[#allocation2 + $0x78c] ss:$16 sps:$4 sm:$0xff]   ;;  %v3786_v10 = vld [vmem:[#allocation2 + $0x780] ss:$16 sps:$4 sm:$0xff]  }
  0xdf   :  { %2690 = vmatprep.subr.bf16.mxu0 %v3700_v11  ;;  %2946 = vmatprep.subr.bf16.mxu1 %v3703_v13  ;;  %v3789_v11 = vld [vmem:[#allocation2 + $0x788] ss:$16 sps:$4 sm:$0xff]   ;;  %v3790_v13 = vld [vmem:[#allocation2 + $0x7a4] ss:$16 sps:$4 sm:$0xff]  }
  0xe2   :  { %2692 = vmatpush1.bf16.msra.mxu0 %v3702_v14  ;;  %2948 = vmatpush1.bf16.msra.mxu1 %v3705_v15  ;;  %v3793_v14 = vld [vmem:[#allocation2 + $0x7ac] ss:$16 sps:$4 sm:$0xff]   ;;  %v3792_v15 = vld [vmem:[#allocation2 + $0x7a0] ss:$16 sps:$4 sm:$0xff]  }
  0xe3   :  { %2694 = vmatprep.subr.bf16.mxu0 %v3706_v16  ;;  %2950 = vmatprep.subr.bf16.mxu1 %v3709_v17  ;;  %v3795_v16 = vld [vmem:[#allocation2 + $0x7a8] ss:$16 sps:$4 sm:$0xff]   ;;  %v3796_v17 = vld [vmem:[#allocation2 + $0x7c4] ss:$16 sps:$4 sm:$0xff]  }
  0xe6   :  { %2696 = vmatpush1.bf16.msra.mxu0 %v3708_v20  ;;  %2952 = vmatpush1.bf16.msra.mxu1 %v3711_v21  ;;  %v3798_v20 = vld [vmem:[#allocation2 + $0x7c0] ss:$16 sps:$4 sm:$0xff]   ;;  %v3801_v21 = vld [vmem:[#allocation2 + $0x7c8] ss:$16 sps:$4 sm:$0xff]  }
  0xe7   :  { %2698 = vmatprep.subr.bf16.mxu0 %v3712_v23  ;;  %2954 = vmatprep.subr.bf16.mxu1 %v3715_v24  ;;  %v3802_v23 = vld [vmem:[#allocation2 + $0x7e4] ss:$16 sps:$4 sm:$0xff]   ;;  %v3805_v24 = vld [vmem:[#allocation2 + $0x7ec] ss:$16 sps:$4 sm:$0xff]  }
  0xe9   :  { %1117 = vmatmul.mubr.f32.vlgmr.msra.gmra.mrb[0].mxu0 %v4041_v22  ;;  %1401 = vmatmul.mubr.f32.vlgmr.msra.gmra.mrb[0].mxu1 %v4041_v22  ;;  %v3732_v22 = vld [vmem:[#allocation2 + $0x660] ss:$16 sps:$4 sm:$0xff]  }
  0xea   :  { %2700 = vmatpush1.bf16.msra.mxu0 %v3714_v26  ;;  %2956 = vmatpush1.bf16.msra.mxu1 %v3717_v27  ;;  %v3804_v26 = vld [vmem:[#allocation2 + $0x7e0] ss:$16 sps:$4 sm:$0xff]   ;;  %v3807_v27 = vld [vmem:[#allocation2 + $0x7e8] ss:$16 sps:$4 sm:$0xff]  }
  0xeb   :  { %2702 = vmatprep.subr.bf16.mxu0 %v3718_v28  ;;  %2958 = vmatprep.subr.bf16.mxu1 %v3721_v29  ;;  %v2293_v28 = vld [vmem:[#allocation5 + $0x40] sm:$0xff]  }
  0xec   :  { %1187 = vmatprep.mubr.f32.mxu0 %v901_v19  ;;  %1471 = vmatprep.mubr.f32.mxu1 %v901_v19  ;;  %v2309_v29 = vld [vmem:[#allocation5 + $0xc0] sm:$0xff]  }
  0xed   :  { %v2095_v19 = vld [vmem:[#allocation5] sm:$0xff]  }
  0xee   :  { %2704 = vmatpush1.bf16.msra.mxu0 %v3720_v12  ;;  %2960 = vmatpush1.bf16.msra.mxu1 %v3723_v30  ;;  %v2301_v12 = vld [vmem:[#allocation5 + $0x80] sm:$0xff]   ;;  %v2294_v30 = vld [vmem:[#allocation5 + $0x48] sm:$0xff]  }
  0xef   :  { %2706 = vmatprep.subr.bf16.mxu0 %v3724_v31  ;;  %2962 = vmatprep.subr.bf16.mxu1 %v3727_v32  ;;  %v2310_v31 = vld [vmem:[#allocation5 + $0xc8] sm:$0xff]  }
  0xf0   :  { %v2286_v32 = vld [vmem:[#allocation5 + $0x8] sm:$0xff]  }
  0xf2   :  { %2708 = vmatpush1.bf16.msra.mxu0 %v3726_v33  ;;  %2964 = vmatpush1.bf16.msra.mxu1 %v3729_v34  ;;  %v2302_v33 = vld [vmem:[#allocation5 + $0x88] sm:$0xff]   ;;  %v2295_v34 = vld [vmem:[#allocation5 + $0x50] sm:$0xff]  }
  0xf3   :  { %2710 = vmatprep.subr.bf16.mxu0 %v3730_v35  ;;  %2966 = vmatprep.subr.bf16.mxu1 %v3733_v36  ;;  %v2311_v35 = vld [vmem:[#allocation5 + $0xd0] sm:$0xff]  }
  0xf4   :  { %v2287_v36 = vld [vmem:[#allocation5 + $0x10] sm:$0xff]  }
  0xf6   :  { %2712 = vmatpush1.bf16.msra.mxu0 %v3732_v22  ;;  %2968 = vmatpush1.bf16.msra.mxu1 %v3735_v37  ;;  %v2303_v22 = vld [vmem:[#allocation5 + $0x90] sm:$0xff]   ;;  %v2296_v37 = vld [vmem:[#allocation5 + $0x58] sm:$0xff]  }
  0xf7   :  { %2714 = vmatprep.subr.bf16.mxu0 %v3736_v38  ;;  %2970 = vmatprep.subr.bf16.mxu1 %v3739_v39  ;;  %v2312_v38 = vld [vmem:[#allocation5 + $0xd8] sm:$0xff]  }
  0xf8   :  { %v2304_v39 = vld [vmem:[#allocation5 + $0x98] sm:$0xff]  }
  0xfa   :  { %2716 = vmatpush1.bf16.msra.mxu0 %v3738_v40  ;;  %2972 = vmatpush1.bf16.msra.mxu1 %v3741_v41  ;;  %v2297_v40 = vld [vmem:[#allocation5 + $0x60] sm:$0xff]  }
  0xfb   :  { %2718 = vmatprep.subr.bf16.mxu0 %v3742_v43  ;;  %2974 = vmatprep.subr.bf16.mxu1 %v3745_v44  ;;  %v2313_v41 = vld [vmem:[#allocation5 + $0xe0] sm:$0xff]  }
  0xfc   :  { %v2289_v43 = vld [vmem:[#allocation5 + $0x20] sm:$0xff]  }
  0xfd   :  { %v2305_v44 = vld [vmem:[#allocation5 + $0xa0] sm:$0xff]  }
  0xfe   :  { %2720 = vmatpush1.bf16.msra.mxu0 %v3744_v45  ;;  %2976 = vmatpush1.bf16.msra.mxu1 %v3747_v46  ;;  %v2298_v45 = vld [vmem:[#allocation5 + $0x68] sm:$0xff]  }
  0xff   :  { %2722 = vmatprep.subr.bf16.mxu0 %v3748_v47  ;;  %2978 = vmatprep.subr.bf16.mxu1 %v3751_v48  ;;  %v2314_v46 = vld [vmem:[#allocation5 + $0xe8] sm:$0xff]  }
 0x100   :  { %v2290_v47 = vld [vmem:[#allocation5 + $0x28] sm:$0xff]  }
 0x101   :  { %v2306_v48 = vld [vmem:[#allocation5 + $0xa8] sm:$0xff]  }
 0x102   :  { %2724 = vmatpush1.bf16.msra.mxu0 %v3750_v50  ;;  %2980 = vmatpush1.bf16.msra.mxu1 %v3753_v51  ;;  %v2299_v50 = vld [vmem:[#allocation5 + $0x70] sm:$0xff]  }
 0x103   :  { %2726 = vmatprep.subr.bf16.mxu0 %v3754_v52  ;;  %2982 = vmatprep.subr.bf16.mxu1 %v3757_v53  ;;  %v2315_v51 = vld [vmem:[#allocation5 + $0xf0] sm:$0xff]  }
 0x104   :  { %v2291_v52 = vld [vmem:[#allocation5 + $0x30] sm:$0xff]  }
 0x105   :  { %v2307_v53 = vld [vmem:[#allocation5 + $0xb0] sm:$0xff]  }
 0x106   :  { %2728 = vmatpush1.bf16.msra.mxu0 %v3756_v54  ;;  %2984 = vmatpush1.bf16.msra.mxu1 %v3759_v55  ;;  %v2300_v54 = vld [vmem:[#allocation5 + $0x78] sm:$0xff]  }
 0x107   :  { %2730 = vmatprep.subr.bf16.mxu0 %v3760_v56  ;;  %2986 = vmatprep.subr.bf16.mxu1 %v3763_v57  ;;  %v2316_v55 = vld [vmem:[#allocation5 + $0xf8] sm:$0xff]  }
 0x108   :  { %v2292_v56 = vld [vmem:[#allocation5 + $0x38] sm:$0xff]  }
 0x109   :  { %v2308_v57 = vld [vmem:[#allocation5 + $0xb8] sm:$0xff]  }
 0x10a   :  { %2732 = vmatpush1.bf16.msra.mxu0 %v3762_v58  ;;  %2988 = vmatpush1.bf16.msra.mxu1 %v3765_v59  ;;  %v3912_v58 = vmov 0.0|0.0   ;;  %v848_v59 = vsub.s32 0, %v4020_v42 }
 0x10b   :  { %2734 = vmatprep.subr.bf16.mxu0 %v3766_v60  ;;  %2990 = vmatprep.subr.bf16.mxu1 %v3769_v61  ;;  %v856_v60 = vsub.s32 2, %v4020_v42  ;;  %v844_v61 = vld [vmem:[%s4197_s4] sm:$0xf] }
 0x10e   :  { %2736 = vmatpush1.bf16.msra.mxu0 %v3768_v62  ;;  %2992 = vmatpush1.bf16.msra.mxu1 %v3771_v63  ;;  %v852_v62 = vsub.s32 1, %v4020_v42  ;;  %v860_v63 = vsub.s32 3, %v4020_v42 }
 0x10f   :  { %2738 = vmatprep.subr.bf16.mxu0 %v3772_v0  ;;  %2994 = vmatprep.subr.bf16.mxu1 %v3775_v1  ;;  %v849_v0 = vrot.slane %v844_v61, %v848_v59  ;;  %v857_v1 = vrot.slane %v844_v61, %v856_v60 }
 0x112   :  { %2740 = vmatpush1.bf16.msra.mxu0 %v3774_v2  ;;  %2996 = vmatpush1.bf16.msra.mxu1 %v3777_v3  ;;  %v853_v2 = vrot.slane %v844_v61, %v852_v62  ;;  %v861_v3 = vrot.slane %v844_v61, %v860_v63 }
 0x113   :  { %2742 = vmatprep.subr.bf16.mxu0 %v3778_v4  ;;  %2998 = vmatprep.subr.bf16.mxu1 %v3781_v5 }
 0x116   :  { %2744 = vmatpush1.bf16.msra.mxu0 %v3780_v6  ;;  %3000 = vmatpush1.bf16.msra.mxu1 %v3783_v7 }
 0x117   :  { %2746 = vmatprep.subr.bf16.mxu0 %v3784_v8  ;;  %3002 = vmatprep.subr.bf16.mxu1 %v3787_v9 }
 0x11a   :  { %2748 = vmatpush1.bf16.msra.mxu0 %v3786_v10  ;;  %3004 = vmatpush1.bf16.msra.mxu1 %v3789_v11 }
 0x11b   :  { %2750 = vmatprep.subr.bf16.mxu0 %v3790_v13  ;;  %3006 = vmatprep.subr.bf16.mxu1 %v3793_v14 }
 0x11e   :  { %2752 = vmatpush1.bf16.msra.mxu0 %v3792_v15  ;;  %3008 = vmatpush1.bf16.msra.mxu1 %v3795_v16 }
 0x11f   :  { %2754 = vmatprep.subr.bf16.mxu0 %v3796_v17  ;;  %3010 = vmatprep.subr.bf16.mxu1 %v3799_v18  ;;  %v2223_v17 = vld [vmem:[%s4200_s7] sm:$0xff]  }
 0x122   :  { %2756 = vmatpush1.bf16.msra.mxu0 %v3798_v20  ;;  %3012 = vmatpush1.bf16.msra.mxu1 %v3801_v21 }
 0x123   :  { %2758 = vmatprep.subr.bf16.mxu0 %v3802_v23  ;;  %3014 = vmatprep.subr.bf16.mxu1 %v3805_v24  ;;  %v2317_v24 = vld [vmem:[%s4200_s7 + $0x8] sm:$0xff]  }
 0x126   :  { %2760 = vmatpush1.bf16.msra.mxu0 %v3804_v26  ;;  %3016 = vmatpush1.bf16.msra.mxu1 %v3807_v27  ;;  %v2318_v27 = vld [vmem:[%s4200_s7 + $0x10] sm:$0xff]  }
 0x127   :  { %3018 = vmatprep.subr.bf16.mxu0 %v2293_v28  ;;  %3050 = vmatprep.subr.bf16.mxu1 %v2309_v29  ;;  %v2320_v28 = vld [vmem:[%s4200_s7 + $0x20] sm:$0xff]   ;;  %v2321_v29 = vld [vmem:[%s4200_s7 + $0x28] sm:$0xff]  }
 0x129   :  { %1188 = vmatmul.mubr.f32.vlgmr.msra.gmra.mrb[0].mxu0 %v4050_v25  ;;  %1472 = vmatmul.mubr.f32.vlgmr.msra.gmra.mrb[0].mxu1 %v4050_v25  ;;  %v2288_v25 = vld [vmem:[#allocation5 + $0x18] sm:$0xff]  }
 0x12a   :  { %3020 = vmatpush3.bf16.msra.mxu0 %v2095_v19  ;;  %3052 = vmatpush3.bf16.msra.mxu1 %v2301_v12  ;;  %v2322_v19 = vld [vmem:[%s4200_s7 + $0x30] sm:$0xff]   ;;  %v2323_v12 = vld [vmem:[%s4200_s7 + $0x38] sm:$0xff]  }
 0x12b   :  { %3022 = vmatprep.subr.bf16.mxu0 %v2294_v30  ;;  %3054 = vmatprep.subr.bf16.mxu1 %v2310_v31  ;;  %v3914_v30 = vmov 0.0   ;;  %v1891_v31 = vld [vmem:[%s4194_s1] sm:$0x3] }
 0x12e   :  { %3024 = vmatpush3.bf16.msra.mxu0 %v2286_v32  ;;  %3056 = vmatpush3.bf16.msra.mxu1 %v2302_v33  ;;  %v3915_v32 = vmov 0   ;;  %v3916_v33 = vmov 2  }
 0x12f   :  { %3026 = vmatprep.subr.bf16.mxu0 %v2295_v34  ;;  %3058 = vmatprep.subr.bf16.mxu1 %v2311_v35  ;;  %v2255_v34 = vld [vmem:[%s4203_s10] sm:$0xff]   ;;  %v2324_v35 = vld [vmem:[%s4203_s10 + $0x8] sm:$0xff]  }
 0x130   :  { %3417 = vset.pattern.permute.xlu0 %v3915_v32  ;;  %3419 = vset.pattern.permute.xlu1 %v3916_v33 }
 0x131   :  { %1895 = vperm.xlu0 %3417, %v1891_v31   ;;  %1915 = vperm.xlu1 %3419, %v1891_v31  }
 0x132   :  { %3028 = vmatpush3.bf16.msra.mxu0 %v2287_v36  ;;  %3060 = vmatpush3.bf16.msra.mxu1 %v2303_v22  ;;  %v3917_v36 = vmov 1   ;;  %v3918_v22 = vmov 3  }
 0x133   :  { %3030 = vmatprep.subr.bf16.mxu0 %v2296_v37  ;;  %3062 = vmatprep.subr.bf16.mxu1 %v2312_v38  ;;  %v1934_v37 = vld [vmem:[%s4195_s2] sm:$0x3]  ;;  %v2325_v38 = vld [vmem:[%s4203_s10 + $0x10] sm:$0xff]  }
 0x135   :  { %3418 = vset.pattern.permute.xlu0 %v3917_v36  ;;  %3420 = vset.pattern.permute.xlu1 %v3918_v22 }
 0x136   :  { %3032 = vmatpush3.bf16.msra.mxu0 %v2288_v25  ;;  %3064 = vmatpush3.bf16.msra.mxu1 %v2304_v39  ;;  %v2326_v25 = vld [vmem:[%s4203_s10 + $0x18] sm:$0xff]  }
 0x137   :  { %3034 = vmatprep.subr.bf16.mxu0 %v2297_v40  ;;  %3066 = vmatprep.subr.bf16.mxu1 %v2313_v41  ;;  %v2091_v41 = vld [vmem:[%s4199_s6] ss:$0 sm:$0xff] }
 0x138   :  { %1905 = vperm.xlu0 %3418, %v1891_v31   ;;  %1925 = vperm.xlu1 %3420, %v1891_v31  }
 0x13a   :  { %3036 = vmatpush3.bf16.msra.mxu0 %v2289_v43  ;;  %3068 = vmatpush3.bf16.msra.mxu1 %v2305_v44 }
 0x13b   :  { %3038 = vmatprep.subr.bf16.mxu0 %v2298_v45  ;;  %3070 = vmatprep.subr.bf16.mxu1 %v2314_v46 }
 0x13c   :  { %3421 = vset.pattern.permute.xlu1 %v3915_v32  ;;  %3422 = vset.pattern.permute.xlu0 %v3915_v32 }
 0x13d   :  { %1937 = vperm.xlu1 %3421, %v1934_v37  }
 0x13e   :  { %3040 = vmatpush3.bf16.msra.mxu0 %v2290_v47  ;;  %3072 = vmatpush3.bf16.msra.mxu1 %v2306_v48 }
 0x13f   :  { %3042 = vmatprep.subr.bf16.mxu0 %v2299_v50  ;;  %3074 = vmatprep.subr.bf16.mxu1 %v2315_v51  ;;  %v2327_v51 = vld [vmem:[%s4203_s10 + $0x20] sm:$0xff]  }
 0x142   :  { %3044 = vmatpush3.bf16.msra.mxu0 %v2291_v52  ;;  %3076 = vmatpush3.bf16.msra.mxu1 %v2307_v53  ;;  %v2328_v52 = vld [vmem:[%s4203_s10 + $0x28] sm:$0xff]   ;;  %v2329_v53 = vld [vmem:[%s4203_s10 + $0x30] sm:$0xff]  }
 0x143   :  { %3046 = vmatprep.subr.bf16.mxu0 %v2300_v54  ;;  %3078 = vmatprep.subr.bf16.mxu1 %v2316_v55  ;;  %v2330_v54 = vld [vmem:[%s4203_s10 + $0x38] sm:$0xff]   ;;  %s3920_s10 = smov [#allocation8]  }
 0x144   :  { %s2073_s0 = sshll.u32 %s3920_s10, 4  ;;  %s2074_s0 = int_to_ptr.vmem [resolvable:$true] %s2073_s0 }
 0x146   :  { %3048 = vmatpush3.bf16.msra.mxu0 %v2292_v56  ;;  %3080 = vmatpush3.bf16.msra.mxu1 %v2308_v57  ;;  %v1892_v57 = vld [vmem:[%s4201_s8] sm:$0xff]  ;;  %s3919_s8 = smov [#allocation7]  }
 0x147   :  { %3081 = vmatprep.subr.bf16.mxu0 %v3912_v58  ;;  %3105 = vmatprep.subr.bf16.mxu1 %v3912_v58  ;;  %v1901_v61 = vrot.slane %v1892_v57, %v848_v59 }
 0x1b0   :  { %v1896_v55 = vpop.permute.xlu0 %1895  ;;  %v1916_v56 = vpop.permute.xlu1 %1915 }
 0x1fc   :  { %v1189_v4 = vpop.f32.mrb[0].mxu0  ;;  %v1473_v5 = vpop.f32.mrb[0].mxu1 }
 0x1fd   :  { %v3129_v6 = vadd.f32 %v1189_v4, %v849_v0  ;;  %v3131_v7 = vadd.f32 %v1473_v5, %v857_v1  ;;  %v1191_v8 = vpop.f32.mrb[1].mxu0  ;;  %v1475_v9 = vpop.f32.mrb[1].mxu1  ;;  %v1911_v0 = vrot.slane %v1892_v57, %v852_v62  ;;  %v1902_v5 = vmul.f32 %v1901_v61, %v1896_v55 }
 0x1fe   :  { %v3130_v10 = vadd.f32 %v1191_v8, %v853_v2  ;;  %v3132_v11 = vadd.f32 %v1475_v9, %v861_v3  ;;  %v1906_v1 = vpop.permute.xlu0 %1905  ;;  %v1926_v2 = vpop.permute.xlu1 %1925  ;;  %v1942_v3 = vsub.s32 4, %v4020_v42  ;;  %v1931_v62 = vrot.slane %v1892_v57, %v860_v63 }
 0x1ff   :  { %v1478_v13 = vmax.f32 %v3129_v6, 0.0  ;;  %v1480_v14 = vmax.f32 %v3131_v7, 0.0  ;;  %v1921_v6 = vrot.slane %v1892_v57, %v856_v60  ;;  %v1912_v9 = vmul.f32 %v1911_v0, %v1906_v1 }
 0x200   :  { %v1479_v15 = vmax.f32 %v3130_v10, 0.0  ;;  %v1481_v16 = vmax.f32 %v3132_v11, 0.0  ;;  %v1943_v10 = vrot.slane %v1892_v57, %v1942_v3 }
 0x202   :  { %v1486_v18 = vcombine.low %v1478_v13, %v1479_v15  ;;  %v1487_v20 = vcombine.low %v1480_v14, %v1481_v16  ;;  %1704 = vmatprep.mubr.f32.mxu0 %v1479_v15  ;;  %1774 = vmatprep.mubr.f32.mxu1 %v1481_v16  ;;  %v1938_v11 = vpop.permute.xlu1 %1937  ;;  %v1932_v16 = vmul.f32 %v1931_v62, %v1926_v2 }
 0x203   :  { %1705 = vmatmul.mubr.f32.vlgmr.msra.gmra.mrb[2].mxu0 %v1478_v13  ;;  %1775 = vmatmul.mubr.f32.vlgmr.msra.gmra.mrb[2].mxu1 %v1480_v14  ;;  %v1922_v13 = vmul.f32 %v1921_v6, %v1916_v56 }
 0x204   :  { %v1494_v21 = vrot.slane %v1486_v18, %v4023_v49  ;;  %v1501_v23 = vrot.slane %v1487_v20, %v4023_v49  ;;  %3083 = vmatpush3.bf16.msra.mxu0 %v2223_v17  ;;  %v2319_v49 = vld [vmem:[%s4200_s7 + $0x18] sm:$0xff]   ;;  %2467 = vmatprep.mubr.msk.f32.mxu0 %vm3913_vm0, %v3914_v30  ;;  %v1944_v17 = vmul.f32 %v1943_v10, %v1938_v11 }
 0x205   :  { %3084 = vmatprep.subr.bf16.mxu0 %v3912_v58  ;;  %2502 = vmatprep.mubr.msk.f32.mxu1 %vm3913_vm0, %v3914_v30 }
 0x206   :  { %v1502_v26 = vcombine.low %v1494_v21, %v1501_v23  ;;  %3107 = vmatpush3.bf16.msra.mxu1 %v2255_v34 }
 0x207   :  { %3108 = vmatprep.subr.bf16.mxu1 %v3912_v58 }
 0x208   :  { %3086 = vmatpush3.bf16.msra.mxu0 %v2317_v24  ;;  %1504 = vst [vmem:[#allocation7] sm:$0xff] %v1502_v26 }
 0x209   :  { %3087 = vmatprep.subr.bf16.mxu0 %v3912_v58 }
 0x20a   :  { %3110 = vmatpush3.bf16.msra.mxu1 %v2324_v35 }
 0x20b   :  { %3111 = vmatprep.subr.bf16.mxu1 %v3912_v58 }
 0x20c   :  { %3089 = vmatpush3.bf16.msra.mxu0 %v2318_v27 }
 0x20d   :  { %3090 = vmatprep.subr.bf16.mxu0 %v3912_v58 }
 0x20e   :  { %3113 = vmatpush3.bf16.msra.mxu1 %v2325_v38 }
 0x20f   :  { %3114 = vmatprep.subr.bf16.mxu1 %v3912_v58 }
 0x210   :  { %3092 = vmatpush3.bf16.msra.mxu0 %v2319_v49 }
 0x211   :  { %3093 = vmatprep.subr.bf16.mxu0 %v3912_v58 }
 0x212   :  { %3116 = vmatpush3.bf16.msra.mxu1 %v2326_v25 }
 0x213   :  { %3117 = vmatprep.subr.bf16.mxu1 %v3912_v58 }
 0x214   :  { %3095 = vmatpush3.bf16.msra.mxu0 %v2320_v28 }
 0x215   :  { %3096 = vmatprep.subr.bf16.mxu0 %v3912_v58 }
 0x216   :  { %3119 = vmatpush3.bf16.msra.mxu1 %v2327_v51 }
 0x217   :  { %3120 = vmatprep.subr.bf16.mxu1 %v3912_v58 }
 0x218   :  { %3098 = vmatpush3.bf16.msra.mxu0 %v2321_v29 }
 0x219   :  { %3099 = vmatprep.subr.bf16.mxu0 %v3912_v58 }
 0x21a   :  { %3122 = vmatpush3.bf16.msra.mxu1 %v2328_v52 }
 0x21b   :  { %3123 = vmatprep.subr.bf16.mxu1 %v3912_v58 }
 0x21c   :  { %3101 = vmatpush3.bf16.msra.mxu0 %v2322_v19 }
 0x21d   :  { %3102 = vmatprep.subr.bf16.mxu0 %v3912_v58 }
 0x21e   :  { %3125 = vmatpush3.bf16.msra.mxu1 %v2329_v53 }
 0x21f   :  { %3126 = vmatprep.subr.bf16.mxu1 %v3912_v58  ;;  %v2092_v58 = vld [vmem:[%s4202_s9] ss:$0 sm:$0xff]  ;;  %s2063_s9 = sshll.u32 %s3919_s8, 4  ;;  %s2064_s9 = int_to_ptr.vmem [resolvable:$true] %s2063_s9 }
 0x220   :  { %3104 = vmatpush3.bf16.msra.mxu0 %v2323_v12  ;;  %s3853_s27 = scalar_lea.vmem %s2064_s9, 128  ;;  %p3858_p3 = scmp.lt.s32.totalorder %s2064_s9, %s2064_s9 }
 0x221   :  { %p3854_p2 = scmp.ne.s32.totalorder %s2064_s9, %s3853_s27  ;;  %p3859_p4 = scmp.lt.s32.totalorder %s3853_s27, %s3853_s27 }
 0x222   :  { %3128 = vmatpush3.bf16.msra.mxu1 %v2330_v54 }
 0x223   :  { %p3860_p5 = por %p3859_p4, %p3858_p3 }
 0x225   :  { %p3861_p6 = pnand %p3860_p5, %p3854_p2 }
 0x2d6   :  { %v2363_v39 = vpop.f32.mrb[2].mxu0  ;;  %v2398_v40 = vpop.f32.mrb[2].mxu1 }
 0x2d7   :  { %v2364_v43 = vpop.f32.mrb[3].mxu0  ;;  %v2399_v44 = vpop.f32.mrb[3].mxu1 }
 0x2d8   :  { %v2365_v45 = vadd.f32 %v2364_v43, %v2363_v39  ;;  %v2400_v46 = vadd.f32 %v2399_v44, %v2398_v40 }
 0x2da   :  { %v1707_v47 = vadd.f32 %v2365_v45, %v2091_v41 }
 0x2dc   :  { %v1777_v48 = vadd.f32 %v2400_v46, %v1707_v47 }
 0x2de   :  { %v1780_v50 = vmax.f32 %v1777_v48, 0.0 }
 0x2e0   :  { %1781 = vst [vmem:[#allocation8] sm:$0x3] %v1780_v50  ;;  %2468 = vmatmul.mubr.f32.vlgmr.msra.gmra.mrb[4].mxu0 %v1780_v50 }
 0x3b3   :  { %v1887_v4 = vpop.f32.mrb[4].mxu0 }
 0x3b4   :  { %v1888_v7 = vadd.f32 %v2092_v58, %v1887_v4  ;;  %v2469_v8 = vpop.f32.mrb[5].mxu0 }
 0x3b6   :  { %v1903_v59 = vadd.f32 %v1902_v5, %v1888_v7 }
 0x3b8   :  { %v1913_v14 = vadd.f32 %v1912_v9, %v1903_v59 }
 0x3ba   :  { %v1923_v15 = vadd.f32 %v1922_v13, %v1913_v14 }
 0x3bc   :  { %v1933_v18 = vadd.f32 %v1932_v16, %v1923_v15 }
 0x3be   :  { %v1945_v20 = vadd.f32 %v1944_v17, %v1933_v18 }
 0x3c0   :  { %v1946_v21 = vmax.f32 %v1945_v20, 0.0 }
 0x3c2   :  { %2503 = vmatmul.mubr.f32.vlgmr.msra.gmra.mrb[4].mxu1 %v1946_v21 }
 0x3c3   :  { %3864 = shalt.err (!%p3861_p6)
}
 0x3c4   :  { %s3865_s1 = scalar_lea.hbm %s4205_s12, 128 }
 0x3c5   :  { %p3866_p7 = scmp.ne.s32.totalorder %s4205_s12, %s3865_s1  ;;  %p3869_p8 = scmp.lt.u32.totalorder %s3865_s1, %s4205_s12 }
 0x3c7   :  { %p3871_p9 = pnand %p3869_p8, %p3866_p7 }
 0x3c9   :  { %3874 = shalt.err (!%p3871_p9)
}
 0x3ca   :  { %2066 = dma.vmem_to_hbm [thread:$0]  %s2064_s9, 128, %s4205_s12, [#allocation4]  }
 0x3cb   :  { %s3875_s18 = scalar_lea.vmem %s2074_s0, 32  ;;  %p3880_p11 = scmp.lt.s32.totalorder %s2074_s0, %s2074_s0 }
 0x3cc   :  { %p3876_p10 = scmp.ne.s32.totalorder %s2074_s0, %s3875_s18  ;;  %p3881_p12 = scmp.lt.s32.totalorder %s3875_s18, %s3875_s18 }
 0x3ce   :  { %p3882_p13 = por %p3881_p12, %p3880_p11 }
 0x3d0   :  { %p3883_p0 = pnand %p3882_p13, %p3876_p10 }
 0x3d2   :  { %3886 = shalt.err (!%p3883_p0)
}
 0x3d3   :  { %s3887_s21 = scalar_lea.hbm %s4206_s13, 32 }
 0x3d4   :  { %p3888_p1 = scmp.ne.s32.totalorder %s4206_s13, %s3887_s21  ;;  %p3891_p2 = scmp.lt.u32.totalorder %s3887_s21, %s4206_s13 }
 0x3d6   :  { %p3893_p3 = pnand %p3891_p2, %p3888_p1 }
 0x3d8   :  { %3896 = shalt.err (!%p3893_p3)
}
 0x3d9   :  { %2076 = dma.vmem_to_hbm [thread:$0]  %s2074_s0, 32, %s4206_s13, [#allocation9]   ;;  %v2093_v42 = vld [vmem:[%s4204_s11] ss:$0 sm:$0xff] }
 0x495   :  { %v2052_v60 = vpop.f32.mrb[4].mxu1 }
 0x496   :  { %v2053_v63 = vadd.f32 %v2093_v42, %v2052_v60  ;;  %v2504_v23 = vpop.f32.mrb[5].mxu1 }
 0x498   :  { %2056 = vst [vmem:[%s4207_s14] sm:$0x3] %v2053_v63 }
 0x499   :  { %3901 = dma.done.wait [#allocation4], 128  }
 0x49a   :  { %3902 = vsyncadd [#allocation4], 4294967168 }
 0x49b   :  { %3903 = dma.done.wait [#allocation9], 32  }
 0x49c   :  { %3904 = vsyncadd [#allocation9], 4294967264 }
 0x49d   :  { %2087 = vsyncpa [#allocation3], 1 }
 0x49e   :  { %2088 = vsyncpa [#allocation6], 1 }
 0x49f   :  { %2089 = vsyncpa [#allocation4], 1 }
 0x4a0   :  { %2090 = vsyncpa [#allocation9], 1 }

</bundles_post_ra>
